<compile_context>
chip_gen: v7x
topology: tpu7x:2x2x1
jax: 0.10.0
libtpu: 0.0.40
codegen_flags: <defaults>
</compile_context>

<pallas_src>
import functools

import jax
import jax.numpy as jnp
from jax.experimental import pallas as pl
from jax.experimental.pallas import tpu as pltpu


def _round_up(v, m):
    return (v + m - 1) // m * m


def _densecat_kernel(x_ref, w1_ref, b1_ref, w2_ref, b2_ref, w3_ref, b3_ref,
                     wp_ref, bp_ref, mask_ref, o_ref, sbuf,
                     *, H, Hq, BASE, R_out, RING_HI, RING_HI_LEN, n_pairs):
    """One grid step: n_pairs (x, y) pairs, 3 shared 3x3 convs + 1x1/BN/ReLU."""
    cdtype = sbuf.dtype
    WC = sbuf.shape[1]
    mask = mask_ref[...]                               # (R_out, 1) f32 real-row mask

    # Re-zero only the ring rows that are read but never rewritten inside the
    # step (top pad of the first image, bottom pad of the last image).  Aligned
    # 8-row tiles, executed every step (NOT gated on program_id, so correct
    # when the grid is split across TensorCores).
    sbuf[pl.ds(0, 8), :] = jnp.zeros((8, WC), cdtype)
    sbuf[pl.ds(RING_HI, RING_HI_LEN), :] = jnp.zeros((RING_HI_LEN, WC), cdtype)

    def conv3x3(load, w_ref, b_ref):
        # 3 row-shifted (R_out, WC) @ (WC, WC) MXU matmuls, f32 accumulation;
        # the dx taps / horizontal zero pad live inside the banded weights.
        acc = jnp.dot(load(0), w_ref[0], preferred_element_type=jnp.float32)
        for dy in (1, 2):
            acc = acc + jnp.dot(load(dy), w_ref[dy],
                                preferred_element_type=jnp.float32)
        return jnp.maximum(acc + b_ref[...], 0.0)      # (R_out, WC) f32

    def load_in(dy):
        return x_ref[0, pl.ds(BASE + dy, R_out), :]

    def load_sb(dy):
        return sbuf[pl.ds(BASE + dy, R_out), :]

    # conv1 reads the pre-padded input block directly.
    a1 = conv3x3(load_in, w1_ref, b1_ref)
    # Store back in padded layout; the row mask zeroes the junk rows, which is
    # exactly what re-creates the zero padding between stacked images.
    # BASE + 1 is a multiple of 8, so these two big stores are sublane-aligned.
    sbuf[pl.ds(BASE + 1, R_out), :] = (mask * a1).astype(cdtype)
    a2 = conv3x3(load_sb, w2_ref, b2_ref)
    sbuf[pl.ds(BASE + 1, R_out), :] = (mask * (a1 + a2)).astype(cdtype)
    a3 = conv3x3(load_sb, w3_ref, b3_ref)

    s = a1 + a2 + a3                                   # (R_out, WC) f32, unmasked
    # x-branch + y-branch per pair (shared weights); all slices 8-row aligned.
    pieces = [s[2 * p * Hq:2 * p * Hq + H, :]
              + s[(2 * p + 1) * Hq:(2 * p + 1) * Hq + H, :]
              for p in range(n_pairs)]
    z = pieces[0] if n_pairs == 1 else jnp.concatenate(pieces, axis=0)

    # 1x1 projection with BN scale folded into the block-diagonal (WC, W*O)
    # weight; output lanes = W*O (lane-dense, multiple of 128 at demo shapes).
    out = jnp.dot(z.astype(wp_ref.dtype), wp_ref[...],
                  preferred_element_type=jnp.float32)
    o_ref[0] = jnp.maximum(out + bp_ref[...], 0.0).astype(o_ref.dtype)


def densecat_cat_add(x, y, params, *, eps=1e-5, compute_dtype=jnp.bfloat16,
                     pairs_per_step=1, nchw_output=True):
    """Fused forward pass of densecat_cat_add.

    x, y: (B, C, H, W) float arrays.  params: dict of module weights.
    compute_dtype: MXU feed dtype (bf16 recommended even for f32 callers;
      accumulation is always f32, bias/BN math stays f32).
    pairs_per_step: (x, y) batch pairs stacked along the matmul M axis per
      grid step.  1 keeps a B-sized "parallel" grid (feeds both v7x
      TensorCores at B>=2); B collapses the grid to one step, which removes
      the ~0.35us/step overhead on single-TC v5e/v6e.
    Layout is most efficient when W*Cin and W*Cout are multiples of 128.
    """
    B, C, H, W = x.shape
    O = params["wout"].shape[0]
    assert y.shape == x.shape
    assert B % pairs_per_step == 0
    cdtype = jnp.dtype(compute_dtype)

    n_pairs = pairs_per_step
    n_img = 2 * n_pairs                    # x and y slabs per step
    steps = B // n_pairs
    WC, WO = W * C, W * O

    Hq = _round_up(H + 2, 8)               # per-image row slab (top pad + H + rest zero)
    BASE = 7                               # leading guard rows -> interior write at BASE+1 (=8)
    R_out = (n_img - 1) * Hq + _round_up(H, 8)     # conv output rows per step
    Rbuf = _round_up(max(BASE + n_img * Hq, BASE + R_out + 2), 8)
    RING_HI = BASE + R_out + 1             # multiple of 8 by construction
    RING_HI_LEN = Rbuf - RING_HI

    # ---- input prep: NCHW -> per-image (Hq, W*C) slabs, stacked per step ----
    def to_slab(a):                                        # (B,C,H,W) -> (B,Hq,WC)
        a = jnp.transpose(a, (0, 2, 3, 1)).reshape(B, H, WC)
        return jnp.pad(a, ((0, 0), (1, Hq - H - 1), (0, 0)))

    stk = jnp.concatenate([to_slab(x)[:, None], to_slab(y)[:, None]], axis=1)
    stk = stk.reshape(steps, n_img * Hq, WC)
    stk = jnp.pad(stk, ((0, 0), (BASE, Rbuf - BASE - n_img * Hq), (0, 0)))
    stk = stk.astype(cdtype)                               # (steps, Rbuf, WC)

    # ---- weights: fold dx taps + horizontal zero pad into banded (WC, WC)
    #      matrices (one per dy); fold BN scale + 1x1 conv into (WC, WO). ----
    def conv_band(w):                                      # (C, C, 3, 3) OIHW
        mats = []
        for dy in range(3):
            m = jnp.zeros((WC, WC), jnp.float32)
            for dx in range(3):
                shift = jnp.eye(W, k=1 - dx, dtype=jnp.float32)   # w_in = w_out + dx - 1
                m = m + jnp.kron(shift, w[:, :, dy, dx].T.astype(jnp.float32))
            mats.append(m)
        return jnp.stack(mats).astype(cdtype)              # (3, WC, WC)

    w1, w2, w3 = (conv_band(params[k]) for k in ("w1", "w2", "w3"))
    b1, b2, b3 = (jnp.tile(params[k].astype(jnp.float32), W).reshape(1, WC)
                  for k in ("b1", "b2", "b3"))

    scale = params["gamma"] / jnp.sqrt(params["var"] + eps)                 # (O,)
    proj_core = params["wout"].reshape(O, C).T.astype(jnp.float32) * scale[None, :]
    wp = jnp.kron(jnp.eye(W, dtype=jnp.float32), proj_core).astype(cdtype)  # (WC, WO)
    bp = jnp.tile((params["beta"] + (params["bout"] - params["mean"]) * scale)
                  .astype(jnp.float32), W).reshape(1, WO)

    # real-row mask over the conv output rows of one step
    mask = ((jnp.arange(R_out) % Hq) < H).astype(jnp.float32).reshape(R_out, 1)

    # ---- pallas_call ----
    x_spec = pl.BlockSpec((1, Rbuf, WC), lambda g: (g, 0, 0))
    out_spec = pl.BlockSpec((1, n_pairs * H, WO), lambda g: (g, 0, 0))

    def const_spec(a):
        nd = a.ndim
        return pl.BlockSpec(a.shape, lambda g, _nd=nd: (0,) * _nd)

    consts = (w1, b1, w2, b2, w3, b3, wp, bp, mask)

    # VMEM budget from the actual buffer sizes (double-buffered in/out/consts
    # + scratch) with headroom; modest floor, capped at v7x's 64 MiB physical.
    isz = cdtype.itemsize
    est = (2 * (Rbuf * WC * isz + n_pairs * H * WO * x.dtype.itemsize)
           + 2 * sum(int(a.size) * int(a.dtype.itemsize) for a in consts)
           + Rbuf * WC * isz)
    vmem_limit = int(min(64 * 2 ** 20, max(4 * 2 ** 20, 2 * est)))

    kernel = functools.partial(
        _densecat_kernel, H=H, Hq=Hq, BASE=BASE, R_out=R_out,
        RING_HI=RING_HI, RING_HI_LEN=RING_HI_LEN, n_pairs=n_pairs)

    out_blk = pl.pallas_call(
        kernel,
        out_shape=jax.ShapeDtypeStruct((steps, n_pairs * H, WO), x.dtype),
        grid_spec=pltpu.PrefetchScalarGridSpec(
            num_scalar_prefetch=0,
            grid=(steps,),
            in_specs=[x_spec] + [const_spec(a) for a in consts],
            out_specs=out_spec,
            scratch_shapes=[pltpu.VMEM((Rbuf, WC), cdtype)]),
        compiler_params=pltpu.CompilerParams(
            # NOTE: on v7x, if profiling shows the step grid serializing on one
            # TensorCore, switch to pltpu.CORE_PARALLEL (or fold the batch with
            # pairs_per_step=B and split rows across cores instead).
            dimension_semantics=("parallel",),
            vmem_limit_bytes=vmem_limit),
    )(stk, *consts)

    out = out_blk.reshape(B, H, W, O)
    if not nchw_output:
        return out            # channels-last consumers skip a full relayout
    # TODO(synk): prefer nchw_output=False when the consumer takes channels-last;
    # this transpose is an extra HBM round trip comparable to the kernel output.
    return jnp.transpose(out, (0, 3, 1, 2))


def densecat_reference(x, y, params, eps=1e-5):
    """Pure-JAX f32 reference matching the PyTorch forward (eval-mode BN)."""
    dn = ("NCHW", "OIHW", "NCHW")
    prec = jax.lax.Precision.HIGHEST

    def c3(v, w, b):
        r = jax.lax.conv_general_dilated(v, w, (1, 1), ((1, 1), (1, 1)),
                                         dimension_numbers=dn, precision=prec)
        return jax.nn.relu(r + b.reshape(1, -1, 1, 1))

    x1 = c3(x, params["w1"], params["b1"])
    x2 = c3(x1, params["w2"], params["b2"])
    x3 = c3(x2 + x1, params["w3"], params["b3"])
    y1 = c3(y, params["w1"], params["b1"])
    y2 = c3(y1, params["w2"], params["b2"])
    y3 = c3(y2 + y1, params["w3"], params["b3"])
    z = x1 + x2 + x3 + y1 + y2 + y3
    p = jax.lax.conv_general_dilated(z, params["wout"], (1, 1), ((0, 0), (0, 0)),
                                     dimension_numbers=dn, precision=prec)
    p = p + params["bout"].reshape(1, -1, 1, 1)
    scale = (params["gamma"] / jnp.sqrt(params["var"] + eps)).reshape(1, -1, 1, 1)
    out = scale * (p - params["mean"].reshape(1, -1, 1, 1)) \
        + params["beta"].reshape(1, -1, 1, 1)
    return jax.nn.relu(out)


if __name__ == "__main__":
    B, Cin, Cout, H, W = 2, 8, 16, 16, 16          # W*Cin = 128, W*Cout = 256

    key = jax.random.PRNGKey(0)
    ks = jax.random.split(key, 16)

    params = dict(
        w1=0.15 * jax.random.normal(ks[0], (Cin, Cin, 3, 3), jnp.float32),
        b1=0.05 * jax.random.normal(ks[1], (Cin,), jnp.float32),
        w2=0.15 * jax.random.normal(ks[2], (Cin, Cin, 3, 3), jnp.float32),
        b2=0.05 * jax.random.normal(ks[3], (Cin,), jnp.float32),
        w3=0.15 * jax.random.normal(ks[4], (Cin, Cin, 3, 3), jnp.float32),
        b3=0.05 * jax.random.normal(ks[5], (Cin,), jnp.float32),
        wout=0.2 * jax.random.normal(ks[6], (Cout, Cin, 1, 1), jnp.float32),
        bout=0.05 * jax.random.normal(ks[7], (Cout,), jnp.float32),
        gamma=1.0 + 0.1 * jax.random.normal(ks[8], (Cout,), jnp.float32),
        beta=0.05 * jax.random.normal(ks[9], (Cout,), jnp.float32),
        mean=0.1 * jax.random.normal(ks[10], (Cout,), jnp.float32),
        var=0.5 + jnp.abs(jax.random.normal(ks[11], (Cout,), jnp.float32)),
    )

    x = jax.random.normal(ks[12], (B, Cin, H, W), jnp.float32)
    y = jax.random.normal(ks[13], (B, Cin, H, W), jnp.float32)

    ref = densecat_reference(x, y, params)

    # (1) exact-path check: f32 MXU feed, whole batch folded into one grid step
    #     (single-TC style config), tight tolerance against the f32 reference.
    out_f32 = jax.block_until_ready(
        densecat_cat_add(x, y, params, compute_dtype=jnp.float32,
                         pairs_per_step=B))
    err = float(jnp.max(jnp.abs(out_f32 - ref)))
    assert jnp.allclose(out_f32, ref, atol=2e-3, rtol=2e-3), \
        f"f32 path max abs err {err}"

    # (2) default perf path: bf16 MXU feed (f32 accumulation), one batch pair
    #     per grid step ("parallel" grid -> both v7x TensorCores at B=2).
    #     Compared against the f32 reference, so the tolerance is bf16-level
    #     (typical normalized error ~1e-2); functional correctness is already
    #     established by the tight f32 check above.
    out_bf16 = jax.block_until_ready(densecat_cat_add(x, y, params))
    rel = float(jnp.max(jnp.abs(out_bf16 - ref) / (1.0 + jnp.abs(ref))))
    assert rel < 1e-1, f"bf16 path normalized max err {rel}"

    print("KERNEL_OK")
</pallas_src>

<mosaic_0001>
module attributes {stable_mosaic.version = 11 : i64} {
  func.func @_densecat_kernel(%arg0: i32, %arg1: memref<1x104x128xf32, #tpu.memory_space<vmem>>, %arg2: memref<3x128x128xf32, #tpu.memory_space<vmem>>, %arg3: memref<1x128xf32, #tpu.memory_space<vmem>>, %arg4: memref<3x128x128xf32, #tpu.memory_space<vmem>>, %arg5: memref<1x128xf32, #tpu.memory_space<vmem>>, %arg6: memref<3x128x128xf32, #tpu.memory_space<vmem>>, %arg7: memref<1x128xf32, #tpu.memory_space<vmem>>, %arg8: memref<128x256xf32, #tpu.memory_space<vmem>>, %arg9: memref<1x256xf32, #tpu.memory_space<vmem>>, %arg10: memref<88x1xf32, #tpu.memory_space<vmem>>, %arg11: memref<1x32x256xf32, #tpu.memory_space<vmem>>, %arg12: memref<104x128xf32, #tpu.memory_space<vmem>>) attributes {dimension_semantics = [#tpu.dimension_semantics<parallel>], iteration_bounds = array<i64: 1>, scalar_prefetch = 0 : i64, scratch_operands = 1 : i64, tpu.core_type = #tpu.core_type<tc>, window_params = [{transform_indices = @transform_0, window_bounds = array<i64: 1, 104, 128>}, {pipeline_mode = #tpu.pipeline_mode<synchronous>, transform_indices = @transform_1, window_bounds = array<i64: 3, 128, 128>}, {pipeline_mode = #tpu.pipeline_mode<synchronous>, transform_indices = @transform_2, window_bounds = array<i64: 1, 128>}, {pipeline_mode = #tpu.pipeline_mode<synchronous>, transform_indices = @transform_3, window_bounds = array<i64: 3, 128, 128>}, {pipeline_mode = #tpu.pipeline_mode<synchronous>, transform_indices = @transform_4, window_bounds = array<i64: 1, 128>}, {pipeline_mode = #tpu.pipeline_mode<synchronous>, transform_indices = @transform_5, window_bounds = array<i64: 3, 128, 128>}, {pipeline_mode = #tpu.pipeline_mode<synchronous>, transform_indices = @transform_6, window_bounds = array<i64: 1, 128>}, {pipeline_mode = #tpu.pipeline_mode<synchronous>, transform_indices = @transform_7, window_bounds = array<i64: 128, 256>}, {pipeline_mode = #tpu.pipeline_mode<synchronous>, transform_indices = @transform_8, window_bounds = array<i64: 1, 256>}, {pipeline_mode = #tpu.pipeline_mode<synchronous>, transform_indices = @transform_9, window_bounds = array<i64: 88, 1>}, {transform_indices = @transform_10, window_bounds = array<i64: 1, 32, 256>}]} {
    %c0 = arith.constant 0 : index
    %c0_0 = arith.constant 0 : index
    %0 = vector.load %arg10[%c0, %c0_0] : memref<88x1xf32, #tpu.memory_space<vmem>>, vector<88x1xf32>
    %cst = arith.constant 0.000000e+00 : f32
    %1 = vector.broadcast %cst : f32 to vector<8x128xf32>
    %c0_1 = arith.constant 0 : index
    %c0_2 = arith.constant 0 : index
    %2 = vector.load %arg12[%c0_1, %c0_2] : memref<104x128xf32, #tpu.memory_space<vmem>>, vector<8x128xf32>
    tpu.vector_store %arg12[%c0_1, %c0_2], %1 {strides = array<i32>} : memref<104x128xf32, #tpu.memory_space<vmem>>, vector<8x128xf32>,
    %cst_3 = arith.constant 0.000000e+00 : f32
    %3 = vector.broadcast %cst_3 : f32 to vector<8x128xf32>
    %c96 = arith.constant 96 : index
    %c0_4 = arith.constant 0 : index
    %4 = vector.load %arg12[%c96, %c0_4] : memref<104x128xf32, #tpu.memory_space<vmem>>, vector<8x128xf32>
    tpu.vector_store %arg12[%c96, %c0_4], %3 {strides = array<i32>} : memref<104x128xf32, #tpu.memory_space<vmem>>, vector<8x128xf32>,
    %c0_5 = arith.constant 0 : index
    %c7 = arith.constant 7 : index
    %c0_6 = arith.constant 0 : index
    %5 = vector.load %arg1[%c0_5, %c7, %c0_6] : memref<1x104x128xf32, #tpu.memory_space<vmem>>, vector<1x88x128xf32>
    %6 = vector.shape_cast %5 : vector<1x88x128xf32> to vector<88x128xf32>
    %c0_7 = arith.constant 0 : index
    %c0_8 = arith.constant 0 : index
    %c0_9 = arith.constant 0 : index
    %7 = vector.load %arg2[%c0_7, %c0_8, %c0_9] : memref<3x128x128xf32, #tpu.memory_space<vmem>>, vector<1x128x128xf32>
    %8 = vector.shape_cast %7 : vector<1x128x128xf32> to vector<128x128xf32>
    %cst_10 = arith.constant dense<0.000000e+00> : vector<88x128xf32>
    %9 = tpu.matmul %6, %8, %cst_10 {dimension_numbers = #tpu.dot_dimension_numbers<[1], [0], [0], [1], [0, 0, 1, 1], [], []>} : vector<88x128xf32>, vector<128x128xf32>, vector<88x128xf32> -> vector<88x128xf32>
    %c0_11 = arith.constant 0 : index
    %c8 = arith.constant 8 : index
    %c0_12 = arith.constant 0 : index
    %10 = vector.load %arg1[%c0_11, %c8, %c0_12] : memref<1x104x128xf32, #tpu.memory_space<vmem>>, vector<1x88x128xf32>
    %11 = vector.shape_cast %10 : vector<1x88x128xf32> to vector<88x128xf32>
    %c1 = arith.constant 1 : index
    %c0_13 = arith.constant 0 : index
    %c0_14 = arith.constant 0 : index
    %12 = vector.load %arg2[%c1, %c0_13, %c0_14] : memref<3x128x128xf32, #tpu.memory_space<vmem>>, vector<1x128x128xf32>
    %13 = vector.shape_cast %12 : vector<1x128x128xf32> to vector<128x128xf32>
    %cst_15 = arith.constant dense<0.000000e+00> : vector<88x128xf32>
    %14 = tpu.matmul %11, %13, %cst_15 {dimension_numbers = #tpu.dot_dimension_numbers<[1], [0], [0], [1], [0, 0, 1, 1], [], []>} : vector<88x128xf32>, vector<128x128xf32>, vector<88x128xf32> -> vector<88x128xf32>
    %15 = arith.addf %9, %14 : vector<88x128xf32>
    %c0_16 = arith.constant 0 : index
    %c9 = arith.constant 9 : index
    %c0_17 = arith.constant 0 : index
    %16 = vector.load %arg1[%c0_16, %c9, %c0_17] : memref<1x104x128xf32, #tpu.memory_space<vmem>>, vector<1x88x128xf32>
    %17 = vector.shape_cast %16 : vector<1x88x128xf32> to vector<88x128xf32>
    %c2 = arith.constant 2 : index
    %c0_18 = arith.constant 0 : index
    %c0_19 = arith.constant 0 : index
    %18 = vector.load %arg2[%c2, %c0_18, %c0_19] : memref<3x128x128xf32, #tpu.memory_space<vmem>>, vector<1x128x128xf32>
    %19 = vector.shape_cast %18 : vector<1x128x128xf32> to vector<128x128xf32>
    %cst_20 = arith.constant dense<0.000000e+00> : vector<88x128xf32>
    %20 = tpu.matmul %17, %19, %cst_20 {dimension_numbers = #tpu.dot_dimension_numbers<[1], [0], [0], [1], [0, 0, 1, 1], [], []>} : vector<88x128xf32>, vector<128x128xf32>, vector<88x128xf32> -> vector<88x128xf32>
    %21 = arith.addf %15, %20 : vector<88x128xf32>
    %c0_21 = arith.constant 0 : index
    %c0_22 = arith.constant 0 : index
    %22 = vector.load %arg3[%c0_21, %c0_22] : memref<1x128xf32, #tpu.memory_space<vmem>>, vector<1x128xf32>
    %23 = vector.broadcast %22 : vector<1x128xf32> to vector<88x128xf32>
    %24 = arith.addf %21, %23 : vector<88x128xf32>
    %cst_23 = arith.constant 0.000000e+00 : f32
    %25 = vector.broadcast %cst_23 : f32 to vector<88x128xf32>
    %26 = arith.maximumf %24, %25 : vector<88x128xf32>
    %27 = vector.broadcast %0 : vector<88x1xf32> to vector<88x128xf32>
    %28 = arith.mulf %27, %26 : vector<88x128xf32>
    %c8_24 = arith.constant 8 : index
    %c0_25 = arith.constant 0 : index
    %29 = vector.load %arg12[%c8_24, %c0_25] : memref<104x128xf32, #tpu.memory_space<vmem>>, vector<88x128xf32>
    tpu.vector_store %arg12[%c8_24, %c0_25], %28 {strides = array<i32>} : memref<104x128xf32, #tpu.memory_space<vmem>>, vector<88x128xf32>,
    %c7_26 = arith.constant 7 : index
    %c0_27 = arith.constant 0 : index
    %30 = vector.load %arg12[%c7_26, %c0_27] : memref<104x128xf32, #tpu.memory_space<vmem>>, vector<88x128xf32>
    %c0_28 = arith.constant 0 : index
    %c0_29 = arith.constant 0 : index
    %c0_30 = arith.constant 0 : index
    %31 = vector.load %arg4[%c0_28, %c0_29, %c0_30] : memref<3x128x128xf32, #tpu.memory_space<vmem>>, vector<1x128x128xf32>
    %32 = vector.shape_cast %31 : vector<1x128x128xf32> to vector<128x128xf32>
    %cst_31 = arith.constant dense<0.000000e+00> : vector<88x128xf32>
    %33 = tpu.matmul %30, %32, %cst_31 {dimension_numbers = #tpu.dot_dimension_numbers<[1], [0], [0], [1], [0, 0, 1, 1], [], []>} : vector<88x128xf32>, vector<128x128xf32>, vector<88x128xf32> -> vector<88x128xf32>
    %c8_32 = arith.constant 8 : index
    %c0_33 = arith.constant 0 : index
    %34 = vector.load %arg12[%c8_32, %c0_33] : memref<104x128xf32, #tpu.memory_space<vmem>>, vector<88x128xf32>
    %c1_34 = arith.constant 1 : index
    %c0_35 = arith.constant 0 : index
    %c0_36 = arith.constant 0 : index
    %35 = vector.load %arg4[%c1_34, %c0_35, %c0_36] : memref<3x128x128xf32, #tpu.memory_space<vmem>>, vector<1x128x128xf32>
    %36 = vector.shape_cast %35 : vector<1x128x128xf32> to vector<128x128xf32>
    %cst_37 = arith.constant dense<0.000000e+00> : vector<88x128xf32>
    %37 = tpu.matmul %34, %36, %cst_37 {dimension_numbers = #tpu.dot_dimension_numbers<[1], [0], [0], [1], [0, 0, 1, 1], [], []>} : vector<88x128xf32>, vector<128x128xf32>, vector<88x128xf32> -> vector<88x128xf32>
    %38 = arith.addf %33, %37 : vector<88x128xf32>
    %c9_38 = arith.constant 9 : index
    %c0_39 = arith.constant 0 : index
    %39 = vector.load %arg12[%c9_38, %c0_39] : memref<104x128xf32, #tpu.memory_space<vmem>>, vector<88x128xf32>
    %c2_40 = arith.constant 2 : index
    %c0_41 = arith.constant 0 : index
    %c0_42 = arith.constant 0 : index
    %40 = vector.load %arg4[%c2_40, %c0_41, %c0_42] : memref<3x128x128xf32, #tpu.memory_space<vmem>>, vector<1x128x128xf32>
    %41 = vector.shape_cast %40 : vector<1x128x128xf32> to vector<128x128xf32>
    %cst_43 = arith.constant dense<0.000000e+00> : vector<88x128xf32>
    %42 = tpu.matmul %39, %41, %cst_43 {dimension_numbers = #tpu.dot_dimension_numbers<[1], [0], [0], [1], [0, 0, 1, 1], [], []>} : vector<88x128xf32>, vector<128x128xf32>, vector<88x128xf32> -> vector<88x128xf32>
    %43 = arith.addf %38, %42 : vector<88x128xf32>
    %c0_44 = arith.constant 0 : index
    %c0_45 = arith.constant 0 : index
    %44 = vector.load %arg5[%c0_44, %c0_45] : memref<1x128xf32, #tpu.memory_space<vmem>>, vector<1x128xf32>
    %45 = vector.broadcast %44 : vector<1x128xf32> to vector<88x128xf32>
    %46 = arith.addf %43, %45 : vector<88x128xf32>
    %cst_46 = arith.constant 0.000000e+00 : f32
    %47 = vector.broadcast %cst_46 : f32 to vector<88x128xf32>
    %48 = arith.maximumf %46, %47 : vector<88x128xf32>
    %49 = arith.addf %26, %48 : vector<88x128xf32>
    %50 = vector.broadcast %0 : vector<88x1xf32> to vector<88x128xf32>
    %51 = arith.mulf %50, %49 : vector<88x128xf32>
    %c8_47 = arith.constant 8 : index
    %c0_48 = arith.constant 0 : index
    %52 = vector.load %arg12[%c8_47, %c0_48] : memref<104x128xf32, #tpu.memory_space<vmem>>, vector<88x128xf32>
    tpu.vector_store %arg12[%c8_47, %c0_48], %51 {strides = array<i32>} : memref<104x128xf32, #tpu.memory_space<vmem>>, vector<88x128xf32>,
    %c7_49 = arith.constant 7 : index
    %c0_50 = arith.constant 0 : index
    %53 = vector.load %arg12[%c7_49, %c0_50] : memref<104x128xf32, #tpu.memory_space<vmem>>, vector<88x128xf32>
    %c0_51 = arith.constant 0 : index
    %c0_52 = arith.constant 0 : index
    %c0_53 = arith.constant 0 : index
    %54 = vector.load %arg6[%c0_51, %c0_52, %c0_53] : memref<3x128x128xf32, #tpu.memory_space<vmem>>, vector<1x128x128xf32>
    %55 = vector.shape_cast %54 : vector<1x128x128xf32> to vector<128x128xf32>
    %cst_54 = arith.constant dense<0.000000e+00> : vector<88x128xf32>
    %56 = tpu.matmul %53, %55, %cst_54 {dimension_numbers = #tpu.dot_dimension_numbers<[1], [0], [0], [1], [0, 0, 1, 1], [], []>} : vector<88x128xf32>, vector<128x128xf32>, vector<88x128xf32> -> vector<88x128xf32>
    %c8_55 = arith.constant 8 : index
    %c0_56 = arith.constant 0 : index
    %57 = vector.load %arg12[%c8_55, %c0_56] : memref<104x128xf32, #tpu.memory_space<vmem>>, vector<88x128xf32>
    %c1_57 = arith.constant 1 : index
    %c0_58 = arith.constant 0 : index
    %c0_59 = arith.constant 0 : index
    %58 = vector.load %arg6[%c1_57, %c0_58, %c0_59] : memref<3x128x128xf32, #tpu.memory_space<vmem>>, vector<1x128x128xf32>
    %59 = vector.shape_cast %58 : vector<1x128x128xf32> to vector<128x128xf32>
    %cst_60 = arith.constant dense<0.000000e+00> : vector<88x128xf32>
    %60 = tpu.matmul %57, %59, %cst_60 {dimension_numbers = #tpu.dot_dimension_numbers<[1], [0], [0], [1], [0, 0, 1, 1], [], []>} : vector<88x128xf32>, vector<128x128xf32>, vector<88x128xf32> -> vector<88x128xf32>
    %61 = arith.addf %56, %60 : vector<88x128xf32>
    %c9_61 = arith.constant 9 : index
    %c0_62 = arith.constant 0 : index
    %62 = vector.load %arg12[%c9_61, %c0_62] : memref<104x128xf32, #tpu.memory_space<vmem>>, vector<88x128xf32>
    %c2_63 = arith.constant 2 : index
    %c0_64 = arith.constant 0 : index
    %c0_65 = arith.constant 0 : index
    %63 = vector.load %arg6[%c2_63, %c0_64, %c0_65] : memref<3x128x128xf32, #tpu.memory_space<vmem>>, vector<1x128x128xf32>
    %64 = vector.shape_cast %63 : vector<1x128x128xf32> to vector<128x128xf32>
    %cst_66 = arith.constant dense<0.000000e+00> : vector<88x128xf32>
    %65 = tpu.matmul %62, %64, %cst_66 {dimension_numbers = #tpu.dot_dimension_numbers<[1], [0], [0], [1], [0, 0, 1, 1], [], []>} : vector<88x128xf32>, vector<128x128xf32>, vector<88x128xf32> -> vector<88x128xf32>
    %66 = arith.addf %61, %65 : vector<88x128xf32>
    %c0_67 = arith.constant 0 : index
    %c0_68 = arith.constant 0 : index
    %67 = vector.load %arg7[%c0_67, %c0_68] : memref<1x128xf32, #tpu.memory_space<vmem>>, vector<1x128xf32>
    %68 = vector.broadcast %67 : vector<1x128xf32> to vector<88x128xf32>
    %69 = arith.addf %66, %68 : vector<88x128xf32>
    %cst_69 = arith.constant 0.000000e+00 : f32
    %70 = vector.broadcast %cst_69 : f32 to vector<88x128xf32>
    %71 = arith.maximumf %69, %70 : vector<88x128xf32>
    %72 = arith.addf %26, %48 : vector<88x128xf32>
    %73 = arith.addf %72, %71 : vector<88x128xf32>
    %74 = vector.extract_strided_slice %73 {offsets = [0, 0], sizes = [16, 128], strides = [1, 1]} : vector<88x128xf32> to vector<16x128xf32>
    %75 = vector.extract_strided_slice %73 {offsets = [24, 0], sizes = [16, 128], strides = [1, 1]} : vector<88x128xf32> to vector<16x128xf32>
    %76 = arith.addf %74, %75 : vector<16x128xf32>
    %77 = vector.extract_strided_slice %73 {offsets = [48, 0], sizes = [16, 128], strides = [1, 1]} : vector<88x128xf32> to vector<16x128xf32>
    %78 = vector.extract_strided_slice %73 {offsets = [72, 0], sizes = [16, 128], strides = [1, 1]} : vector<88x128xf32> to vector<16x128xf32>
    %79 = arith.addf %77, %78 : vector<16x128xf32>
    %80 = tpu.concatenate %76, %79 in 0 : vector<16x128xf32>, vector<16x128xf32> -> vector<32x128xf32>
    %c0_70 = arith.constant 0 : index
    %c0_71 = arith.constant 0 : index
    %81 = vector.load %arg8[%c0_70, %c0_71] : memref<128x256xf32, #tpu.memory_space<vmem>>, vector<128x256xf32>
    %cst_72 = arith.constant dense<0.000000e+00> : vector<32x256xf32>
    %82 = tpu.matmul %80, %81, %cst_72 {dimension_numbers = #tpu.dot_dimension_numbers<[1], [0], [0], [1], [0, 0, 1, 1], [], []>} : vector<32x128xf32>, vector<128x256xf32>, vector<32x256xf32> -> vector<32x256xf32>
    %c0_73 = arith.constant 0 : index
    %c0_74 = arith.constant 0 : index
    %83 = vector.load %arg9[%c0_73, %c0_74] : memref<1x256xf32, #tpu.memory_space<vmem>>, vector<1x256xf32>
    %84 = vector.broadcast %83 : vector<1x256xf32> to vector<32x256xf32>
    %85 = arith.addf %82, %84 : vector<32x256xf32>
    %cst_75 = arith.constant 0.000000e+00 : f32
    %86 = vector.broadcast %cst_75 : f32 to vector<32x256xf32>
    %87 = arith.maximumf %85, %86 : vector<32x256xf32>
    %c0_76 = arith.constant 0 : index
    %c0_77 = arith.constant 0 : index
    %c0_78 = arith.constant 0 : index
    %88 = vector.load %arg11[%c0_76, %c0_77, %c0_78] : memref<1x32x256xf32, #tpu.memory_space<vmem>>, vector<1x32x256xf32>
    %89 = vector.shape_cast %88 : vector<1x32x256xf32> to vector<32x256xf32>
    %90 = vector.shape_cast %87 : vector<32x256xf32> to vector<1x32x256xf32>
    tpu.vector_store %arg11[%c0_76, %c0_77, %c0_78], %90 {strides = array<i32>} : memref<1x32x256xf32, #tpu.memory_space<vmem>>, vector<1x32x256xf32>,
    return
  }
  func.func @transform_0(%arg0: i32) -> (i32, i32, i32) {
    %c0_i32 = arith.constant 0 : i32
    %c0_i32_0 = arith.constant 0 : i32
    %c0_i32_1 = arith.constant 0 : i32
    return %arg0, %c0_i32, %c0_i32_0 : i32, i32, i32
  }
  func.func @transform_1(%arg0: i32) -> (i32, i32, i32) {
    %c0_i32 = arith.constant 0 : i32
    %c0_i32_0 = arith.constant 0 : i32
    %c0_i32_1 = arith.constant 0 : i32
    %c0_i32_2 = arith.constant 0 : i32
    return %c0_i32, %c0_i32_0, %c0_i32_1 : i32, i32, i32
  }
  func.func @transform_2(%arg0: i32) -> (i32, i32) {
    %c0_i32 = arith.constant 0 : i32
    %c0_i32_0 = arith.constant 0 : i32
    %c0_i32_1 = arith.constant 0 : i32
    return %c0_i32, %c0_i32_0 : i32, i32
  }
  func.func @transform_3(%arg0: i32) -> (i32, i32, i32) {
    %c0_i32 = arith.constant 0 : i32
    %c0_i32_0 = arith.constant 0 : i32
    %c0_i32_1 = arith.constant 0 : i32
    %c0_i32_2 = arith.constant 0 : i32
    return %c0_i32, %c0_i32_0, %c0_i32_1 : i32, i32, i32
  }
  func.func @transform_4(%arg0: i32) -> (i32, i32) {
    %c0_i32 = arith.constant 0 : i32
    %c0_i32_0 = arith.constant 0 : i32
    %c0_i32_1 = arith.constant 0 : i32
    return %c0_i32, %c0_i32_0 : i32, i32
  }
  func.func @transform_5(%arg0: i32) -> (i32, i32, i32) {
    %c0_i32 = arith.constant 0 : i32
    %c0_i32_0 = arith.constant 0 : i32
    %c0_i32_1 = arith.constant 0 : i32
    %c0_i32_2 = arith.constant 0 : i32
    return %c0_i32, %c0_i32_0, %c0_i32_1 : i32, i32, i32
  }
  func.func @transform_6(%arg0: i32) -> (i32, i32) {
    %c0_i32 = arith.constant 0 : i32
    %c0_i32_0 = arith.constant 0 : i32
    %c0_i32_1 = arith.constant 0 : i32
    return %c0_i32, %c0_i32_0 : i32, i32
  }
  func.func @transform_7(%arg0: i32) -> (i32, i32) {
    %c0_i32 = arith.constant 0 : i32
    %c0_i32_0 = arith.constant 0 : i32
    %c0_i32_1 = arith.constant 0 : i32
    return %c0_i32, %c0_i32_0 : i32, i32
  }
  func.func @transform_8(%arg0: i32) -> (i32, i32) {
    %c0_i32 = arith.constant 0 : i32
    %c0_i32_0 = arith.constant 0 : i32
    %c0_i32_1 = arith.constant 0 : i32
    return %c0_i32, %c0_i32_0 : i32, i32
  }
  func.func @transform_9(%arg0: i32) -> (i32, i32) {
    %c0_i32 = arith.constant 0 : i32
    %c0_i32_0 = arith.constant 0 : i32
    %c0_i32_1 = arith.constant 0 : i32
    return %c0_i32, %c0_i32_0 : i32, i32
  }
  func.func @transform_10(%arg0: i32) -> (i32, i32, i32) {
    %c0_i32 = arith.constant 0 : i32
    %c0_i32_0 = arith.constant 0 : i32
    %c0_i32_1 = arith.constant 0 : i32
    return %arg0, %c0_i32, %c0_i32_0 : i32, i32, i32
  }
}

</mosaic_0001>

<bundles_post_ra>
// kernel: tpu_custom_call.1
= control target key start
LH: loop header
LB: loop body
LE: loop exit
PB: predicated region body
PF: predicated region fallthrough
CT: control target
= control target key end

     0   :  { %15 = vsyncpa [#allocation4], 0  ;;  %s3795_s0 = inlined_call_operand.hbm [shape: f32[1,104,128], index: 0, kind: input, shape index: {}]   ;;  %s3796_s1 = inlined_call_operand.hbm [shape: f32[3,128,128], index: 1, kind: input, shape index: {}]   ;;  %s3797_s2 = inlined_call_operand.vmem [shape: f32[1,128], index: 2, kind: input, shape index: {}]   ;;  %s3798_s3 = inlined_call_operand.hbm [shape: f32[3,128,128], index: 3, kind: input, shape index: {}]   ;;  %s3799_s4 = inlined_call_operand.vmem [shape: f32[1,128], index: 4, kind: input, shape index: {}]   ;;  %s3800_s5 = inlined_call_operand.hbm [shape: f32[3,128,128], index: 5, kind: input, shape index: {}]   ;;  %s3801_s6 = inlined_call_operand.vmem [shape: f32[1,128], index: 6, kind: input, shape index: {}]   ;;  %s3802_s7 = inlined_call_operand.hbm [shape: f32[128,256], index: 7, kind: input, shape index: {}]   ;;  %s3803_s8 = inlined_call_operand.vmem [shape: f32[1,256], index: 8, kind: input, shape index: {}]   ;;  %s3804_s9 = inlined_call_operand.vmem [shape: f32[88,1], index: 9, kind: input, shape index: {}]   ;;  %s3805_s10 = inlined_call_operand.hbm [shape: f32[1,32,256], index: 10, kind: output, shape index: {}]  }
   0x1   :  { %16 = vsyncpa [#allocation7], 0 }
   0x2   :  { %17 = vsyncpa [#allocation10], 0 }
   0x3   :  { %18 = vsyncpa [#allocation5], 0  ;;  %s3075_s13 = smov [#allocation6]   ;;  %s3076_s15 = smov [#allocation9]  }
   0x4   :  { %s36_s14 = sshll.u32 %s3075_s13, 4  ;;  %s64_s16 = sshll.u32 %s3076_s15, 4  ;;  %s37_s14 = int_to_ptr.vmem [resolvable:$true] %s36_s14  ;;  %s3144_s16 = int_to_ptr.vmem [resolvable:$true] %s64_s16 }
   0x5   :  { %s2935_s19 = scalar_lea.hbm %s3796_s1, 6144 }
   0x6   :  { %p2936_p0 = scmp.ne.s32.totalorder %s3796_s1, %s2935_s19  ;;  %p2939_p1 = scmp.lt.u32.totalorder %s2935_s19, %s3796_s1 }
   0x8   :  { %p2941_p2 = pnand %p2939_p1, %p2936_p0 }
   0xa   :  { %2944 = shalt.err (!%p2941_p2)
}
   0xb   :  { %s2945_s24 = scalar_lea.vmem %s37_s14, 6144  ;;  %p2950_p4 = scmp.lt.s32.totalorder %s37_s14, %s37_s14 }
   0xc   :  { %p2946_p3 = scmp.ne.s32.totalorder %s37_s14, %s2945_s24  ;;  %p2951_p5 = scmp.lt.s32.totalorder %s2945_s24, %s2945_s24 }
   0xe   :  { %p2952_p6 = por %p2951_p5, %p2950_p4 }
  0x10   :  { %p2953_p7 = pnand %p2952_p6, %p2946_p3 }
  0x12   :  { %2956 = shalt.err (!%p2953_p7)
}
  0x13   :  { %s3077_s25 = smov 128   ;;  %s3078_s26 = smov 8  }
  0x14   :  { %42 = dma.hbm_to_vmem [thread:$0]  %s3796_s1, 6144, %s37_s14, [#allocation7], %s3077_s25, %s3077_s25, %s3078_s26  }
  0x15   :  { %s2957_s11 = scalar_lea.hbm %s3800_s5, 6144 }
  0x16   :  { %p2958_p8 = scmp.ne.s32.totalorder %s3800_s5, %s2957_s11  ;;  %p2961_p9 = scmp.lt.u32.totalorder %s2957_s11, %s3800_s5 }
  0x18   :  { %p2963_p10 = pnand %p2961_p9, %p2958_p8 }
  0x1a   :  { %2966 = shalt.err (!%p2963_p10)
}
  0x1b   :  { %s2967_s18 = scalar_lea.vmem %s3144_s16, 6144  ;;  %p2972_p12 = scmp.lt.s32.totalorder %s3144_s16, %s3144_s16 }
  0x1c   :  { %p2968_p11 = scmp.ne.s32.totalorder %s3144_s16, %s2967_s18  ;;  %p2973_p13 = scmp.lt.s32.totalorder %s2967_s18, %s2967_s18 }
  0x1e   :  { %p2974_p0 = por %p2973_p13, %p2972_p12 }
  0x20   :  { %p2975_p1 = pnand %p2974_p0, %p2968_p11 }
  0x22   :  { %2978 = shalt.err (!%p2975_p1)
}
  0x23   :  { %70 = dma.hbm_to_vmem [thread:$0]  %s3800_s5, 6144, %s3144_s16, [#allocation10], %s3077_s25, %s3077_s25, %s3078_s26  }
  0x24   :  { %s3079_s19 = smov [#allocation3]   ;;  %s3080_s21 = smov [#allocation8]  }
  0x25   :  { %s24_s20 = sshll.u32 %s3079_s19, 4  ;;  %s50_s22 = sshll.u32 %s3080_s21, 4  ;;  %s25_s20 = int_to_ptr.vmem [resolvable:$true] %s24_s20  ;;  %s3181_s22 = int_to_ptr.vmem [resolvable:$true] %s50_s22 }
  0x26   :  { %s2979_s27 = scalar_lea.hbm %s3795_s0, 1664 }
  0x27   :  { %p2980_p2 = scmp.ne.s32.totalorder %s3795_s0, %s2979_s27  ;;  %p2983_p3 = scmp.lt.u32.totalorder %s2979_s27, %s3795_s0 }
  0x29   :  { %p2985_p4 = pnand %p2983_p3, %p2980_p2 }
  0x2b   :  { %2988 = shalt.err (!%p2985_p4)
}
  0x2c   :  { %s2989_s5 = scalar_lea.vmem %s25_s20, 1664  ;;  %p2994_p6 = scmp.lt.s32.totalorder %s25_s20, %s25_s20 }
  0x2d   :  { %p2990_p5 = scmp.ne.s32.totalorder %s25_s20, %s2989_s5  ;;  %p2995_p7 = scmp.lt.s32.totalorder %s2989_s5, %s2989_s5 }
  0x2f   :  { %p2996_p8 = por %p2995_p7, %p2994_p6 }
  0x31   :  { %p2997_p9 = pnand %p2996_p8, %p2990_p5 }
  0x33   :  { %3000 = shalt.err (!%p2997_p9)
}
  0x34   :  { %30 = dma.hbm_to_vmem [thread:$0]  %s3795_s0, 1664, %s25_s20, [#allocation4], %s3077_s25, %s3077_s25, %s3078_s26  }
  0x35   :  { %s3001_s17 = scalar_lea.hbm %s3798_s3, 6144 }
  0x36   :  { %p3002_p10 = scmp.ne.s32.totalorder %s3798_s3, %s3001_s17  ;;  %p3005_p11 = scmp.lt.u32.totalorder %s3001_s17, %s3798_s3 }
  0x38   :  { %p3007_p12 = pnand %p3005_p11, %p3002_p10 }
  0x3a   :  { %3010 = shalt.err (!%p3007_p12)
}
  0x3b   :  { %s3011_s21 = scalar_lea.vmem %s3181_s22, 6144  ;;  %p3016_p0 = scmp.lt.s32.totalorder %s3181_s22, %s3181_s22 }
  0x3c   :  { %p3012_p13 = scmp.ne.s32.totalorder %s3181_s22, %s3011_s21  ;;  %p3017_p1 = scmp.lt.s32.totalorder %s3011_s21, %s3011_s21 }
  0x3e   :  { %p3018_p2 = por %p3017_p1, %p3016_p0 }
  0x40   :  { %p3019_p3 = pnand %p3018_p2, %p3012_p13 }
  0x42   :  { %3022 = shalt.err (!%p3019_p3)
}
  0x43   :  { %56 = dma.hbm_to_vmem [thread:$0]  %s3798_s3, 6144, %s3181_s22, [#allocation7], %s3077_s25, %s3077_s25, %s3078_s26  }
  0x44   :  { %s3081_s23 = smov [#allocation11]   ;;  %s3023_s29 = scalar_lea.hbm %s3802_s7, 4096 }
  0x45   :  { %s78_s24 = sshll.u32 %s3081_s23, 4  ;;  %p3024_p4 = scmp.ne.s32.totalorder %s3802_s7, %s3023_s29  ;;  %s79_s24 = int_to_ptr.vmem [resolvable:$true] %s78_s24 }
  0x46   :  { %p3027_p5 = scmp.lt.u32.totalorder %s3023_s29, %s3802_s7 }
  0x48   :  { %p3029_p6 = pnand %p3027_p5, %p3024_p4 }
  0x4a   :  { %3032 = shalt.err (!%p3029_p6)
}
  0x4b   :  { %s3033_s12 = scalar_lea.vmem %s79_s24, 4096  ;;  %p3038_p8 = scmp.lt.s32.totalorder %s79_s24, %s79_s24 }
  0x4c   :  { %p3034_p7 = scmp.ne.s32.totalorder %s79_s24, %s3033_s12  ;;  %p3039_p9 = scmp.lt.s32.totalorder %s3033_s12, %s3033_s12 }
  0x4e   :  { %p3040_p10 = por %p3039_p9, %p3038_p8 }
  0x50   :  { %p3041_p11 = pnand %p3040_p10, %p3034_p7 }
  0x52   :  { %3044 = shalt.err (!%p3041_p11)
}
  0x53   :  { %s3082_s3 = smov 256   ;;  %s3083_s25 = smov 16  }
  0x54   :  { %84 = dma.hbm_to_vmem [thread:$0]  %s3802_s7, 4096, %s79_s24, [#allocation10], %s3082_s3, %s3082_s3, %s3083_s25  }
  0x55   :  { %3067 = dma.done.wait [#allocation4], 1664  }
  0x56   :  { %3068 = vsyncadd [#allocation4], 4294965632 }
  0x57   :  { %3069 = dma.done.wait [#allocation7], 12288  }
  0x58   :  { %3070 = vsyncadd [#allocation7], 4294955008 }
  0x59   :  { %3071 = dma.done.wait [#allocation10], 10240  }
  0x5a   :  { %3072 = vsyncadd [#allocation10], 4294957056  ;;  %v3084_v0 = vmov 0.0|0.0   ;;  %v3085_v1 = vmov 0.0   ;;  %vm3086_vm0 = vmmov 0   ;;  %v3087_v2 = vmov 0  }
  0x5b   :  { %2669 = vmatprep.subr.bf16.mxu0 %v3084_v0  ;;  %2693 = vmatprep.subr.bf16.mxu1 %v3084_v0  ;;  %115 = vst [vmem:[#allocation2] sm:$0xff] %v3085_v1  ;;  %116 = vst [vmem:[#allocation2 + $0x60] sm:$0xff] %v3085_v1  ;;  %v156_v3 = vld [vmem:[#allocation6 + $0x80] sm:$0xff]  ;;  %v157_v4 = vld [vmem:[#allocation6 + $0x88] sm:$0xff] }
  0x5c   :  { %2116 = vmatprep.mubr.msk.f32.mxu0 %vm3086_vm0, %v3085_v1  ;;  %2181 = vmatprep.mubr.msk.f32.mxu1 %vm3086_vm0, %v3085_v1  ;;  %v128_v5 = vld [vmem:[#allocation6] sm:$0xff]  ;;  %v2670_v6 = vpack.c.bf16 %v157_v4, %v156_v3  ;;  %v129_v7 = vld [vmem:[#allocation6 + $0x8] sm:$0xff]  ;;  %v158_v8 = vld [vmem:[#allocation6 + $0x90] sm:$0xff] }
  0x5d   :  { %2931 = vset.pattern.permute.xlu0 %v3087_v2  ;;  %2932 = vset.pattern.permute.xlu1 %v3087_v2  ;;  %v159_v9 = vld [vmem:[#allocation6 + $0x98] sm:$0xff]  ;;  %v2694_v10 = vpack.c.bf16 %v129_v7, %v128_v5  ;;  %v130_v11 = vld [vmem:[#allocation6 + $0x10] sm:$0xff]  ;;  %v160_v15 = vld [vmem:[#allocation6 + $0xa0] sm:$0xff] }
  0x5e   :  { %v131_v12 = vld [vmem:[#allocation6 + $0x18] sm:$0xff]  ;;  %2671 = vmatpush3.bf16.msra.mxu0 %v2670_v6  ;;  %v2673_v13 = vpack.c.bf16 %v159_v9, %v158_v8  ;;  %v161_v16 = vld [vmem:[#allocation6 + $0xa8] sm:$0xff]  ;;  %v132_v17 = vld [vmem:[#allocation6 + $0x20] sm:$0xff] }
  0x5f   :  { %2695 = vmatpush3.bf16.msra.mxu1 %v2694_v10  ;;  %2672 = vmatprep.subr.bf16.mxu0 %v3084_v0  ;;  %v2697_v14 = vpack.c.bf16 %v131_v12, %v130_v11  ;;  %v133_v18 = vld [vmem:[#allocation6 + $0x28] sm:$0xff]  ;;  %v2676_v19 = vpack.c.bf16 %v161_v16, %v160_v15  ;;  %v162_v21 = vld [vmem:[#allocation6 + $0xb0] sm:$0xff]  ;;  %v163_v22 = vld [vmem:[#allocation6 + $0xb8] sm:$0xff] }
  0x60   :  { %2696 = vmatprep.subr.bf16.mxu1 %v3084_v0  ;;  %v2700_v20 = vpack.c.bf16 %v133_v18, %v132_v17  ;;  %v134_v23 = vld [vmem:[#allocation6 + $0x30] sm:$0xff]  ;;  %v135_v24 = vld [vmem:[#allocation6 + $0x38] sm:$0xff]  ;;  %v2679_v25 = vpack.c.bf16 %v163_v22, %v162_v21  ;;  %v164_v27 = vld [vmem:[#allocation6 + $0xc0] sm:$0xff] }
  0x61   :  { %v2703_v26 = vpack.c.bf16 %v135_v24, %v134_v23  ;;  %v165_v28 = vld [vmem:[#allocation6 + $0xc8] sm:$0xff]  ;;  %v136_v29 = vld [vmem:[#allocation6 + $0x40] sm:$0xff]  ;;  %v166_v33 = vld [vmem:[#allocation6 + $0xd0] sm:$0xff] }
  0x62   :  { %2674 = vmatpush3.bf16.msra.mxu0 %v2673_v13  ;;  %v137_v30 = vld [vmem:[#allocation6 + $0x48] sm:$0xff]  ;;  %v2682_v31 = vpack.c.bf16 %v165_v28, %v164_v27  ;;  %v167_v34 = vld [vmem:[#allocation6 + $0xd8] sm:$0xff]  ;;  %v138_v35 = vld [vmem:[#allocation6 + $0x50] sm:$0xff] }
  0x63   :  { %2698 = vmatpush3.bf16.msra.mxu1 %v2697_v14  ;;  %2675 = vmatprep.subr.bf16.mxu0 %v3084_v0  ;;  %v2706_v32 = vpack.c.bf16 %v137_v30, %v136_v29  ;;  %v139_v36 = vld [vmem:[#allocation6 + $0x58] sm:$0xff]  ;;  %v2685_v37 = vpack.c.bf16 %v167_v34, %v166_v33  ;;  %v168_v39 = vld [vmem:[#allocation6 + $0xe0] sm:$0xff]  ;;  %v169_v40 = vld [vmem:[#allocation6 + $0xe8] sm:$0xff] }
  0x64   :  { %2699 = vmatprep.subr.bf16.mxu1 %v3084_v0  ;;  %v2709_v38 = vpack.c.bf16 %v139_v36, %v138_v35  ;;  %v140_v41 = vld [vmem:[#allocation6 + $0x60] sm:$0xff]  ;;  %v141_v42 = vld [vmem:[#allocation6 + $0x68] sm:$0xff]  ;;  %v2688_v43 = vpack.c.bf16 %v169_v40, %v168_v39  ;;  %v170_v45 = vld [vmem:[#allocation6 + $0xf0] sm:$0xff] }
  0x65   :  { %v2712_v44 = vpack.c.bf16 %v141_v42, %v140_v41  ;;  %v171_v46 = vld [vmem:[#allocation6 + $0xf8] sm:$0xff]  ;;  %v142_v47 = vld [vmem:[#allocation6 + $0x70] sm:$0xff]  ;;  %v424_v52 = vld [vmem:[#allocation6 + $0x100] sm:$0xff] }
  0x66   :  { %2677 = vmatpush3.bf16.msra.mxu0 %v2676_v19  ;;  %v143_v48 = vld [vmem:[#allocation6 + $0x78] sm:$0xff]  ;;  %v2691_v49 = vpack.c.bf16 %v171_v46, %v170_v45  ;;  %v104_v50 = vld [vmem:[%s3804_s9] sm:$0xff]  ;;  %v425_v53 = vld [vmem:[#allocation6 + $0x108] sm:$0xff] }
  0x67   :  { %2701 = vmatpush3.bf16.msra.mxu1 %v2700_v20  ;;  %2678 = vmatprep.subr.bf16.mxu0 %v3084_v0  ;;  %v2715_v51 = vpack.c.bf16 %v143_v48, %v142_v47  ;;  %v106_v54 = vld [vmem:[%s3804_s9 + $0x10] sm:$0xff]  ;;  %v105_v55 = vld [vmem:[%s3804_s9 + $0x8] sm:$0xff]  ;;  %v2718_v57 = vpack.c.bf16 %v425_v53, %v424_v52  ;;  %v107_v58 = vld [vmem:[%s3804_s9 + $0x18] sm:$0xff] }
  0x68   :  { %2702 = vmatprep.subr.bf16.mxu1 %v3084_v0  ;;  %602 = vperm.xlu0 %2931, %v104_v50   ;;  %v144_v56 = vld [vmem:[#allocation3 + $0x8] sm:$0xff]  ;;  %v426_v60 = vld [vmem:[#allocation6 + $0x110] sm:$0xff]  ;;  %v427_v61 = vld [vmem:[#allocation6 + $0x118] sm:$0xff] }
  0x69   :  { %612 = vperm.xlu1 %2932, %v106_v54   ;;  %v117_v59 = vld [vmem:[#allocation3 + $0x7] sm:$0xff]  ;;  %v108_v62 = vld [vmem:[%s3804_s9 + $0x20] sm:$0xff]  ;;  %v145_v63 = vld [vmem:[#allocation3 + $0x10] sm:$0xff]  ;;  %v2721_v4 = vpack.c.bf16 %v427_v61, %v426_v60 }
  0x6a   :  { %2680 = vmatpush3.bf16.msra.mxu0 %v2679_v25  ;;  %v109_v2 = vld [vmem:[%s3804_s9 + $0x28] sm:$0xff]  ;;  %v118_v3 = vld [vmem:[#allocation3 + $0xf] sm:$0xff]  ;;  %v146_v8 = vld [vmem:[#allocation3 + $0x18] sm:$0xff] }
  0x6b   :  { %2704 = vmatpush3.bf16.msra.mxu1 %v2703_v26  ;;  %2681 = vmatprep.subr.bf16.mxu0 %v3084_v0  ;;  %v428_v5 = vld [vmem:[#allocation6 + $0x120] sm:$0xff]  ;;  %v429_v6 = vld [vmem:[#allocation6 + $0x128] sm:$0xff]  ;;  %v430_v12 = vld [vmem:[#allocation6 + $0x130] sm:$0xff] }
  0x6c   :  { %2705 = vmatprep.subr.bf16.mxu1 %v3084_v0  ;;  %607 = vperm.xlu0 %2931, %v105_v55   ;;  %v110_v7 = vld [vmem:[%s3804_s9 + $0x30] sm:$0xff]  ;;  %v111_v9 = vld [vmem:[%s3804_s9 + $0x38] sm:$0xff]  ;;  %v2724_v11 = vpack.c.bf16 %v429_v6, %v428_v5  ;;  %v431_v13 = vld [vmem:[#allocation6 + $0x138] sm:$0xff] }
  0x6d   :  { %617 = vperm.xlu1 %2932, %v107_v58   ;;  %v119_v10 = vld [vmem:[#allocation3 + $0x17] sm:$0xff]  ;;  %v147_v15 = vld [vmem:[#allocation3 + $0x20] sm:$0xff]  ;;  %v2727_v18 = vpack.c.bf16 %v431_v13, %v430_v12  ;;  %v432_v19 = vld [vmem:[#allocation6 + $0x140] sm:$0xff] }
  0x6e   :  { %2683 = vmatpush3.bf16.msra.mxu0 %v2682_v31  ;;  %v112_v14 = vld [vmem:[%s3804_s9 + $0x40] sm:$0xff]  ;;  %v113_v16 = vld [vmem:[%s3804_s9 + $0x48] sm:$0xff]  ;;  %v433_v20 = vld [vmem:[#allocation6 + $0x148] sm:$0xff] }
  0x6f   :  { %2707 = vmatpush3.bf16.msra.mxu1 %v2706_v32  ;;  %2684 = vmatprep.subr.bf16.mxu0 %v3084_v0  ;;  %v120_v17 = vld [vmem:[#allocation3 + $0x1f] sm:$0xff]  ;;  %v114_v21 = vld [vmem:[%s3804_s9 + $0x50] sm:$0xff]  ;;  %v2730_v24 = vpack.c.bf16 %v433_v20, %v432_v19  ;;  %v149_v27 = vld [vmem:[#allocation3 + $0x30] sm:$0xff] }
  0x70   :  { %2708 = vmatprep.subr.bf16.mxu1 %v3084_v0  ;;  %622 = vperm.xlu0 %2931, %v108_v62   ;;  %v148_v22 = vld [vmem:[#allocation3 + $0x28] sm:$0xff]  ;;  %v434_v25 = vld [vmem:[#allocation6 + $0x150] sm:$0xff]  ;;  %v435_v26 = vld [vmem:[#allocation6 + $0x158] sm:$0xff] }
  0x71   :  { %627 = vperm.xlu1 %2932, %v109_v2   ;;  %v121_v23 = vld [vmem:[#allocation3 + $0x27] sm:$0xff]  ;;  %v122_v28 = vld [vmem:[#allocation3 + $0x2f] sm:$0xff]  ;;  %v2733_v29 = vpack.c.bf16 %v435_v26, %v434_v25  ;;  %v150_v32 = vld [vmem:[#allocation3 + $0x38] sm:$0xff] }
  0x72   :  { %2686 = vmatpush3.bf16.msra.mxu0 %v2685_v37  ;;  %v436_v30 = vld [vmem:[#allocation6 + $0x160] sm:$0xff]  ;;  %v437_v31 = vld [vmem:[#allocation6 + $0x168] sm:$0xff]  ;;  %v438_v35 = vld [vmem:[#allocation6 + $0x170] sm:$0xff] }
  0x73   :  { %2710 = vmatpush3.bf16.msra.mxu1 %v2709_v38  ;;  %2687 = vmatprep.subr.bf16.mxu0 %v3084_v0  ;;  %v123_v33 = vld [vmem:[#allocation3 + $0x37] sm:$0xff]  ;;  %v2736_v34 = vpack.c.bf16 %v437_v31, %v436_v30  ;;  %v439_v36 = vld [vmem:[#allocation6 + $0x178] sm:$0xff]  ;;  %v152_v40 = vld [vmem:[#allocation3 + $0x48] sm:$0xff] }
  0x74   :  { %2711 = vmatprep.subr.bf16.mxu1 %v3084_v0  ;;  %632 = vperm.xlu0 %2931, %v110_v7   ;;  %v151_v37 = vld [vmem:[#allocation3 + $0x40] sm:$0xff]  ;;  %v2739_v39 = vpack.c.bf16 %v439_v36, %v438_v35  ;;  %v153_v42 = vld [vmem:[#allocation3 + $0x50] sm:$0xff]  ;;  %v718_v60 = vld [vmem:[#allocation8 + $0x90] sm:$0xff] }
  0x75   :  { %637 = vperm.xlu1 %2932, %v111_v9   ;;  %v124_v38 = vld [vmem:[#allocation3 + $0x3f] sm:$0xff]  ;;  %v125_v41 = vld [vmem:[#allocation3 + $0x47] sm:$0xff]  ;;  %v127_v45 = vld [vmem:[#allocation3 + $0x57] sm:$0xff] }
  0x76   :  { %2689 = vmatpush3.bf16.msra.mxu0 %v2688_v43  ;;  %v126_v43 = vld [vmem:[#allocation3 + $0x4f] sm:$0xff]  ;;  %v414_v48 = vld [vmem:[#allocation3 + $0x19] sm:$0xff]  ;;  %v419_v53 = vld [vmem:[#allocation3 + $0x41] sm:$0xff] }
  0x77   :  { %2713 = vmatpush3.bf16.msra.mxu1 %v2712_v44  ;;  %2690 = vmatprep.subr.bf16.mxu0 %v3084_v0  ;;  %v154_v44 = vld [vmem:[#allocation3 + $0x58] sm:$0xff]  ;;  %v412_v46 = vld [vmem:[#allocation3 + $0x9] sm:$0xff]  ;;  %v719_v61 = vld [vmem:[#allocation8 + $0x98] sm:$0xff] }
  0x78   :  { %2714 = vmatprep.subr.bf16.mxu1 %v3084_v0  ;;  %642 = vperm.xlu0 %2931, %v112_v14   ;;  %v413_v47 = vld [vmem:[#allocation3 + $0x11] sm:$0xff]  ;;  %v416_v50 = vld [vmem:[#allocation3 + $0x29] sm:$0xff]  ;;  %v418_v52 = vld [vmem:[#allocation3 + $0x39] sm:$0xff]  ;;  %v2745_v62 = vpack.c.bf16 %v719_v61, %v718_v60 }
  0x79   :  { %647 = vperm.xlu1 %2932, %v113_v16   ;;  %v420_v54 = vld [vmem:[#allocation3 + $0x49] sm:$0xff]  ;;  %v421_v55 = vld [vmem:[#allocation3 + $0x51] sm:$0xff]  ;;  %v695_v20 = vld [vmem:[#allocation8 + $0x38] sm:$0xff] }
  0x7a   :  { %2692 = vmatpush3.bf16.msra.mxu0 %v2691_v49  ;;  %v415_v49 = vld [vmem:[#allocation3 + $0x21] sm:$0xff]  ;;  %v717_v58 = vld [vmem:[#allocation8 + $0x88] sm:$0xff]  ;;  %v690_v7 = vld [vmem:[#allocation8 + $0x10] sm:$0xff] }
  0x7b   :  { %2716 = vmatpush3.bf16.msra.mxu1 %v2715_v51  ;;  %2717 = vmatprep.subr.bf16.mxu0 %v3084_v0  ;;  %v417_v51 = vld [vmem:[#allocation3 + $0x31] sm:$0xff]  ;;  %v692_v13 = vld [vmem:[#allocation8 + $0x20] sm:$0xff]  ;;  %v731_v35 = vld [vmem:[#allocation8 + $0xf8] sm:$0xff] }
  0x7c   :  { %2741 = vmatprep.subr.bf16.mxu1 %v3084_v0  ;;  %652 = vperm.xlu0 %2931, %v114_v21   ;;  %v721_v2 = vld [vmem:[#allocation8 + $0xa8] sm:$0xff]  ;;  %v722_v9 = vld [vmem:[#allocation8 + $0xb0] sm:$0xff]  ;;  %v696_v25 = vld [vmem:[#allocation8 + $0x40] sm:$0xff] }
  0x7d   :  { %2117 = vmatmul.mubr.f32.vlgmr.msra.gmra.mrb[0].mxu0 %v144_v56  ;;  %v422_v56 = vld [vmem:[#allocation3 + $0x59] sm:$0xff]  ;;  %v689_v5 = vld [vmem:[#allocation8 + $0x8] sm:$0xff] }
  0x7e   :  { %2182 = vmatmul.mubr.f32.vlgmr.msra.gmra.mrb[0].mxu1 %v117_v59  ;;  %2719 = vmatpush3.bf16.msra.mxu0 %v2718_v57  ;;  %v716_v57 = vld [vmem:[#allocation8 + $0x80] sm:$0xff]  ;;  %v693_v14 = vld [vmem:[#allocation8 + $0x28] sm:$0xff]  ;;  %v694_v19 = vld [vmem:[#allocation8 + $0x30] sm:$0xff] }
  0x7f   :  { %2119 = vmatprep.mubr.msk.f32.mxu0 %vm3086_vm0, %v3085_v1  ;;  %2184 = vmatprep.mubr.msk.f32.mxu1 %vm3086_vm0, %v3085_v1  ;;  %v2742_v59 = vpack.c.bf16 %v717_v58, %v716_v57  ;;  %v2772_v16 = vpack.c.bf16 %v693_v14, %v692_v13  ;;  %v726_v21 = vld [vmem:[#allocation8 + $0xd0] sm:$0xff]  ;;  %v697_v26 = vld [vmem:[#allocation8 + $0x48] sm:$0xff] }
  0x80   :  { %2720 = vmatprep.subr.bf16.mxu0 %v3084_v0  ;;  %v698_v31 = vld [vmem:[#allocation8 + $0x50] sm:$0xff] }
  0x81   :  { %2120 = vmatmul.mubr.f32.gmra.mrb[2].mxu0 %v145_v63  ;;  %2743 = vmatpush3.bf16.msra.mxu1 %v2742_v59  ;;  %v720_v63 = vld [vmem:[#allocation8 + $0xa0] sm:$0xff] }
  0x82   :  { %2185 = vmatmul.mubr.f32.gmra.mrb[2].mxu1 %v118_v3  ;;  %2122 = vmatprep.mubr.msk.f32.mxu0 %vm3086_vm0, %v3085_v1  ;;  %v688_v3 = vld [vmem:[#allocation8] sm:$0xff] }
  0x83   :  { %2722 = vmatpush3.bf16.msra.mxu0 %v2721_v4  ;;  %2187 = vmatprep.mubr.msk.f32.mxu1 %vm3086_vm0, %v3085_v1  ;;  %v2748_v4 = vpack.c.bf16 %v721_v2, %v720_v63  ;;  %v2766_v6 = vpack.c.bf16 %v689_v5, %v688_v3 }
  0x84   :  { %2723 = vmatprep.subr.bf16.mxu0 %v3084_v0  ;;  %2744 = vmatprep.subr.bf16.mxu1 %v3084_v0 }
  0x85   :  { %2123 = vmatmul.mubr.f32.gmra.mrb[4].mxu0 %v146_v8  ;;  %2746 = vmatpush3.bf16.msra.mxu1 %v2745_v62  ;;  %v691_v8 = vld [vmem:[#allocation8 + $0x18] sm:$0xff] }
  0x86   :  { %2188 = vmatmul.mubr.f32.gmra.mrb[4].mxu1 %v119_v10  ;;  %2125 = vmatprep.mubr.msk.f32.mxu0 %vm3086_vm0, %v3085_v1  ;;  %v2769_v10 = vpack.c.bf16 %v691_v8, %v690_v7 }
  0x87   :  { %2190 = vmatprep.mubr.msk.f32.mxu1 %vm3086_vm0, %v3085_v1  ;;  %2725 = vmatpush3.bf16.msra.mxu0 %v2724_v11  ;;  %v723_v11 = vld [vmem:[#allocation8 + $0xb8] sm:$0xff] }
  0x88   :  { %2726 = vmatprep.subr.bf16.mxu0 %v3084_v0  ;;  %2747 = vmatprep.subr.bf16.mxu1 %v3084_v0  ;;  %v2751_v12 = vpack.c.bf16 %v723_v11, %v722_v9 }
  0x89   :  { %2126 = vmatmul.mubr.f32.gmra.mrb[6].mxu0 %v147_v15  ;;  %2749 = vmatpush3.bf16.msra.mxu1 %v2748_v4  ;;  %v724_v15 = vld [vmem:[#allocation8 + $0xc0] sm:$0xff] }
  0x8a   :  { %2191 = vmatmul.mubr.f32.gmra.mrb[6].mxu1 %v120_v17  ;;  %2128 = vmatprep.mubr.msk.f32.mxu0 %vm3086_vm0, %v3085_v1  ;;  %v725_v17 = vld [vmem:[#allocation8 + $0xc8] sm:$0xff] }
  0x8b   :  { %2193 = vmatprep.mubr.msk.f32.mxu1 %vm3086_vm0, %v3085_v1  ;;  %2728 = vmatpush3.bf16.msra.mxu0 %v2727_v18  ;;  %v2754_v18 = vpack.c.bf16 %v725_v17, %v724_v15 }
  0x8c   :  { %2729 = vmatprep.subr.bf16.mxu0 %v3084_v0  ;;  %2750 = vmatprep.subr.bf16.mxu1 %v3084_v0 }
  0x8d   :  { %2129 = vmatmul.mubr.f32.gmra.mrb[8].mxu0 %v148_v22  ;;  %2752 = vmatpush3.bf16.msra.mxu1 %v2751_v12  ;;  %v2775_v22 = vpack.c.bf16 %v695_v20, %v694_v19 }
  0x8e   :  { %2194 = vmatmul.mubr.f32.gmra.mrb[8].mxu1 %v121_v23  ;;  %2131 = vmatprep.mubr.msk.f32.mxu0 %vm3086_vm0, %v3085_v1  ;;  %v727_v23 = vld [vmem:[#allocation8 + $0xd8] sm:$0xff] }
  0x8f   :  { %2196 = vmatprep.mubr.msk.f32.mxu1 %vm3086_vm0, %v3085_v1  ;;  %2731 = vmatpush3.bf16.msra.mxu0 %v2730_v24  ;;  %v2757_v24 = vpack.c.bf16 %v727_v23, %v726_v21 }
  0x90   :  { %2732 = vmatprep.subr.bf16.mxu0 %v3084_v0  ;;  %2753 = vmatprep.subr.bf16.mxu1 %v3084_v0 }
  0x91   :  { %2132 = vmatmul.mubr.f32.gmra.mrb[10].mxu0 %v149_v27  ;;  %2755 = vmatpush3.bf16.msra.mxu1 %v2754_v18  ;;  %v728_v27 = vld [vmem:[#allocation8 + $0xe0] sm:$0xff] }
  0x92   :  { %2197 = vmatmul.mubr.f32.gmra.mrb[10].mxu1 %v122_v28  ;;  %2134 = vmatprep.mubr.msk.f32.mxu0 %vm3086_vm0, %v3085_v1  ;;  %v2778_v28 = vpack.c.bf16 %v697_v26, %v696_v25 }
  0x93   :  { %2199 = vmatprep.mubr.msk.f32.mxu1 %vm3086_vm0, %v3085_v1  ;;  %2734 = vmatpush3.bf16.msra.mxu0 %v2733_v29  ;;  %v729_v29 = vld [vmem:[#allocation8 + $0xe8] sm:$0xff] }
  0x94   :  { %2735 = vmatprep.subr.bf16.mxu0 %v3084_v0  ;;  %2756 = vmatprep.subr.bf16.mxu1 %v3084_v0  ;;  %v2760_v30 = vpack.c.bf16 %v729_v29, %v728_v27 }
  0x95   :  { %2135 = vmatmul.mubr.f32.gmra.mrb[12].mxu0 %v150_v32  ;;  %2758 = vmatpush3.bf16.msra.mxu1 %v2757_v24  ;;  %v699_v32 = vld [vmem:[#allocation8 + $0x58] sm:$0xff] }
  0x96   :  { %2200 = vmatmul.mubr.f32.gmra.mrb[12].mxu1 %v123_v33  ;;  %2137 = vmatprep.mubr.msk.f32.mxu0 %vm3086_vm0, %v3085_v1  ;;  %v730_v33 = vld [vmem:[#allocation8 + $0xf0] sm:$0xff] }
  0x97   :  { %2202 = vmatprep.mubr.msk.f32.mxu1 %vm3086_vm0, %v3085_v1  ;;  %2737 = vmatpush3.bf16.msra.mxu0 %v2736_v34  ;;  %v2781_v34 = vpack.c.bf16 %v699_v32, %v698_v31  ;;  %v2763_v36 = vpack.c.bf16 %v731_v35, %v730_v33 }
  0x98   :  { %2738 = vmatprep.subr.bf16.mxu0 %v3084_v0  ;;  %2759 = vmatprep.subr.bf16.mxu1 %v3084_v0 }
  0x99   :  { %2138 = vmatmul.mubr.f32.gmra.mrb[14].mxu0 %v151_v37  ;;  %2761 = vmatpush3.bf16.msra.mxu1 %v2760_v30  ;;  %v700_v37 = vld [vmem:[#allocation8 + $0x60] sm:$0xff] }
  0x9a   :  { %2203 = vmatmul.mubr.f32.gmra.mrb[14].mxu1 %v124_v38  ;;  %2140 = vmatprep.mubr.msk.f32.mxu0 %vm3086_vm0, %v3085_v1  ;;  %v701_v38 = vld [vmem:[#allocation8 + $0x68] sm:$0xff] }
  0x9b   :  { %2205 = vmatprep.mubr.msk.f32.mxu1 %vm3086_vm0, %v3085_v1  ;;  %2740 = vmatpush3.bf16.msra.mxu0 %v2739_v39  ;;  %v2784_v39 = vpack.c.bf16 %v701_v38, %v700_v37  ;;  %v3399_v37 = vld [vmem:[%s3797_s2] ss:$0 sm:$0xff] }
  0x9c   :  { %2765 = vmatprep.subr.bf16.mxu0 %v3084_v0  ;;  %2762 = vmatprep.subr.bf16.mxu1 %v3084_v0 }
  0x9d   :  { %2141 = vmatmul.mubr.f32.gmra.mrb[16].mxu0 %v152_v40  ;;  %2764 = vmatpush3.bf16.msra.mxu1 %v2763_v36  ;;  %v702_v40 = vld [vmem:[#allocation8 + $0x70] sm:$0xff] }
  0x9e   :  { %2206 = vmatmul.mubr.f32.gmra.mrb[16].mxu1 %v125_v41  ;;  %2143 = vmatprep.mubr.msk.f32.mxu0 %vm3086_vm0, %v3085_v1  ;;  %v703_v41 = vld [vmem:[#allocation8 + $0x78] sm:$0xff] }
  0x9f   :  { %2208 = vmatprep.mubr.msk.f32.mxu1 %vm3086_vm0, %v3085_v1  ;;  %2789 = vmatprep.subr.bf16.mxu1 %v3084_v0 }
  0xa1   :  { %2144 = vmatmul.mubr.f32.gmra.mrb[18].mxu0 %v153_v42  ;;  %v2787_v42 = vpack.c.bf16 %v703_v41, %v702_v40  ;;  %v984_v41 = vld [vmem:[#allocation8 + $0x100] sm:$0xff] }
  0xa2   :  { %2209 = vmatmul.mubr.f32.gmra.mrb[18].mxu1 %v126_v43  ;;  %2146 = vmatprep.mubr.msk.f32.mxu0 %vm3086_vm0, %v3085_v1 }
  0xa3   :  { %2211 = vmatprep.mubr.msk.f32.mxu1 %vm3086_vm0, %v3085_v1 }
  0xa5   :  { %2147 = vmatmul.mubr.f32.gmra.mrb[20].mxu0 %v154_v44 }
  0xa6   :  { %2212 = vmatmul.mubr.f32.gmra.mrb[20].mxu1 %v127_v45  ;;  %2246 = vmatprep.mubr.msk.f32.mxu0 %vm3086_vm0, %v3085_v1 }
  0xa7   :  { %2311 = vmatprep.mubr.msk.f32.mxu1 %vm3086_vm0, %v3085_v1 }
  0xa9   :  { %2247 = vmatmul.mubr.f32.vlgmr.msra.gmra.mrb[22].mxu0 %v412_v46 }
  0xaa   :  { %2249 = vmatprep.mubr.msk.f32.mxu0 %vm3086_vm0, %v3085_v1  ;;  %2767 = vmatpush3.bf16.msra.mxu0 %v2766_v6 }
  0xab   :  { %2768 = vmatprep.subr.bf16.mxu0 %v3084_v0 }
  0xad   :  { %2250 = vmatmul.mubr.f32.gmra.mrb[24].mxu0 %v413_v47 }
  0xae   :  { %2252 = vmatprep.mubr.msk.f32.mxu0 %vm3086_vm0, %v3085_v1  ;;  %2770 = vmatpush3.bf16.msra.mxu0 %v2769_v10 }
  0xaf   :  { %2771 = vmatprep.subr.bf16.mxu0 %v3084_v0 }
  0xb1   :  { %2253 = vmatmul.mubr.f32.gmra.mrb[26].mxu0 %v414_v48 }
  0xb2   :  { %2255 = vmatprep.mubr.msk.f32.mxu0 %vm3086_vm0, %v3085_v1  ;;  %2773 = vmatpush3.bf16.msra.mxu0 %v2772_v16 }
  0xb3   :  { %2774 = vmatprep.subr.bf16.mxu0 %v3084_v0 }
  0xb5   :  { %2256 = vmatmul.mubr.f32.gmra.mrb[28].mxu0 %v415_v49 }
  0xb6   :  { %2258 = vmatprep.mubr.msk.f32.mxu0 %vm3086_vm0, %v3085_v1  ;;  %2776 = vmatpush3.bf16.msra.mxu0 %v2775_v22 }
  0xb7   :  { %2777 = vmatprep.subr.bf16.mxu0 %v3084_v0 }
  0xb9   :  { %2259 = vmatmul.mubr.f32.gmra.mrb[30].mxu0 %v416_v50 }
  0xba   :  { %2261 = vmatprep.mubr.msk.f32.mxu0 %vm3086_vm0, %v3085_v1  ;;  %2779 = vmatpush3.bf16.msra.mxu0 %v2778_v28 }
  0xbb   :  { %2780 = vmatprep.subr.bf16.mxu0 %v3084_v0 }
  0xbd   :  { %2262 = vmatmul.mubr.f32.gmra.mrb[32].mxu0 %v417_v51 }
  0xbe   :  { %2264 = vmatprep.mubr.msk.f32.mxu0 %vm3086_vm0, %v3085_v1  ;;  %2782 = vmatpush3.bf16.msra.mxu0 %v2781_v34 }
  0xbf   :  { %2783 = vmatprep.subr.bf16.mxu0 %v3084_v0 }
  0xc1   :  { %2265 = vmatmul.mubr.f32.gmra.mrb[34].mxu0 %v418_v52 }
  0xc2   :  { %2267 = vmatprep.mubr.msk.f32.mxu0 %vm3086_vm0, %v3085_v1  ;;  %2785 = vmatpush3.bf16.msra.mxu0 %v2784_v39 }
  0xc3   :  { %2786 = vmatprep.subr.bf16.mxu0 %v3084_v0 }
  0xc5   :  { %2268 = vmatmul.mubr.f32.gmra.mrb[36].mxu0 %v419_v53 }
  0xc6   :  { %2270 = vmatprep.mubr.msk.f32.mxu0 %vm3086_vm0, %v3085_v1  ;;  %2788 = vmatpush3.bf16.msra.mxu0 %v2787_v42  ;;  %v985_v42 = vld [vmem:[#allocation8 + $0x108] sm:$0xff] }
  0xc7   :  { %2813 = vmatprep.subr.bf16.mxu0 %v3084_v0 }
  0xc9   :  { %2271 = vmatmul.mubr.f32.gmra.mrb[38].mxu0 %v420_v54 }
  0xca   :  { %2273 = vmatprep.mubr.msk.f32.mxu0 %vm3086_vm0, %v3085_v1 }
  0xcd   :  { %2274 = vmatmul.mubr.f32.gmra.mrb[40].mxu0 %v421_v55 }
  0xce   :  { %2276 = vmatprep.mubr.msk.f32.mxu0 %vm3086_vm0, %v3085_v1 }
  0xd1   :  { %2277 = vmatmul.mubr.f32.gmra.mrb[42].mxu0 %v422_v56 }
  0xd2   :  { %2376 = vmatprep.mubr.msk.f32.mxu0 %vm3086_vm0, %v3085_v1 }
 0x150   :  { %v238_v43 = vpop.f32.mrb[0].mxu0 }
 0x151   :  { %v2118_v44 = vpop.f32.mrb[1].mxu0  ;;  %v358_v45 = vpop.f32.mrb[0].mxu1 }
 0x152   :  { %v359_v46 = vadd.f32 %v358_v45, %v238_v43  ;;  %v2183_v47 = vpop.f32.mrb[1].mxu1  ;;  %v3404_v43 = vpop.permute.xlu0 %602 }
 0x154   :  { %v243_v48 = vpop.f32.mrb[2].mxu0 }
 0x155   :  { %v2121_v49 = vpop.f32.mrb[3].mxu0  ;;  %v363_v50 = vpop.f32.mrb[2].mxu1 }
 0x156   :  { %v364_v51 = vadd.f32 %v363_v50, %v243_v48  ;;  %v2186_v52 = vpop.f32.mrb[3].mxu1  ;;  %v2790_v49 = vpack.c.bf16 %v985_v42, %v984_v41  ;;  %v995_v41 = vld [vmem:[#allocation8 + $0x158] sm:$0xff] }
 0x157   :  { %v986_v52 = vld [vmem:[#allocation8 + $0x110] sm:$0xff] }
 0x158   :  { %v248_v53 = vpop.f32.mrb[4].mxu0 }
 0x159   :  { %v2124_v54 = vpop.f32.mrb[5].mxu0  ;;  %v368_v55 = vpop.f32.mrb[4].mxu1 }
 0x15a   :  { %v369_v56 = vadd.f32 %v368_v55, %v248_v53  ;;  %v2189_v57 = vpop.f32.mrb[5].mxu1  ;;  %v987_v53 = vld [vmem:[#allocation8 + $0x118] sm:$0xff] }
 0x15c   :  { %v253_v58 = vpop.f32.mrb[6].mxu0 }
 0x15d   :  { %v2127_v59 = vpop.f32.mrb[7].mxu0  ;;  %v373_v60 = vpop.f32.mrb[6].mxu1 }
 0x15e   :  { %v3380_v61 = vadd.f32 %v373_v60, %v253_v58  ;;  %v2192_v62 = vpop.f32.mrb[7].mxu1  ;;  %v3414_v59 = vpop.permute.xlu0 %607 }
 0x160   :  { %v258_v63 = vpop.f32.mrb[8].mxu0 }
 0x161   :  { %v2130_v2 = vpop.f32.mrb[9].mxu0  ;;  %v378_v3 = vpop.f32.mrb[8].mxu1 }
 0x162   :  { %v3382_v4 = vadd.f32 %v378_v3, %v258_v63  ;;  %v2195_v5 = vpop.f32.mrb[9].mxu1  ;;  %v3425_v63 = vpop.permute.xlu1 %612  ;;  %v988_v2 = vld [vmem:[#allocation8 + $0x120] sm:$0xff]  ;;  %v989_v3 = vld [vmem:[#allocation8 + $0x128] sm:$0xff] }
 0x164   :  { %v263_v6 = vpop.f32.mrb[10].mxu0 }
 0x165   :  { %v2133_v7 = vpop.f32.mrb[11].mxu0  ;;  %v383_v8 = vpop.f32.mrb[10].mxu1 }
 0x166   :  { %v3384_v9 = vadd.f32 %v383_v8, %v263_v6  ;;  %v2198_v10 = vpop.f32.mrb[11].mxu1 }
 0x168   :  { %v268_v11 = vpop.f32.mrb[12].mxu0 }
 0x169   :  { %v2136_v12 = vpop.f32.mrb[13].mxu0  ;;  %v388_v13 = vpop.f32.mrb[12].mxu1 }
 0x16a   :  { %v3386_v14 = vadd.f32 %v388_v13, %v268_v11  ;;  %v2201_v15 = vpop.f32.mrb[13].mxu1  ;;  %v2796_v11 = vpack.c.bf16 %v989_v3, %v988_v2 }
 0x16b   :  { %v990_v15 = vld [vmem:[#allocation8 + $0x130] sm:$0xff] }
 0x16c   :  { %v273_v16 = vpop.f32.mrb[14].mxu0 }
 0x16d   :  { %v2139_v17 = vpop.f32.mrb[15].mxu0  ;;  %v393_v18 = vpop.f32.mrb[14].mxu1 }
 0x16e   :  { %v3388_v19 = vadd.f32 %v393_v18, %v273_v16  ;;  %v2204_v20 = vpop.f32.mrb[15].mxu1 }
 0x16f   :  { %v3440_v20 = vpop.permute.xlu1 %617 }
 0x170   :  { %v278_v21 = vpop.f32.mrb[16].mxu0 }
 0x171   :  { %v2142_v22 = vpop.f32.mrb[17].mxu0  ;;  %v398_v23 = vpop.f32.mrb[16].mxu1 }
 0x172   :  { %v3390_v24 = vadd.f32 %v398_v23, %v278_v21  ;;  %v2207_v25 = vpop.f32.mrb[17].mxu1 }
 0x174   :  { %v283_v26 = vpop.f32.mrb[18].mxu0 }
 0x175   :  { %v2145_v27 = vpop.f32.mrb[19].mxu0  ;;  %v403_v28 = vpop.f32.mrb[18].mxu1 }
 0x176   :  { %v3392_v29 = vadd.f32 %v403_v28, %v283_v26  ;;  %v2210_v30 = vpop.f32.mrb[19].mxu1  ;;  %v992_v26 = vld [vmem:[#allocation8 + $0x140] sm:$0xff]  ;;  %v993_v27 = vld [vmem:[#allocation8 + $0x148] sm:$0xff] }
 0x178   :  { %v288_v31 = vpop.f32.mrb[20].mxu0 }
 0x179   :  { %v2148_v32 = vpop.f32.mrb[21].mxu0  ;;  %v408_v33 = vpop.f32.mrb[20].mxu1 }
 0x17a   :  { %v3394_v34 = vadd.f32 %v408_v33, %v288_v31  ;;  %v2213_v35 = vpop.f32.mrb[21].mxu1  ;;  %v3455_v32 = vpop.permute.xlu0 %622 }
 0x17c   :  { %v506_v36 = vpop.f32.mrb[22].mxu0 }
 0x17d   :  { %v560_v38 = vadd.f32 %v506_v36, %v359_v46  ;;  %v2248_v39 = vpop.f32.mrb[23].mxu0 }
 0x17e   :  { %v994_v39 = vld [vmem:[#allocation8 + $0x150] sm:$0xff] }
 0x17f   :  { %v3402_v40 = vadd.f32 %v3399_v37, %v560_v38 }
 0x180   :  { %v511_v44 = vpop.f32.mrb[24].mxu0 }
 0x181   :  { %v589_v45 = vmax.f32 %v3402_v40, 0.0  ;;  %v561_v47 = vadd.f32 %v511_v44, %v364_v51  ;;  %v2251_v48 = vpop.f32.mrb[25].mxu0  ;;  %v2793_v51 = vpack.c.bf16 %v987_v53, %v986_v52 }
 0x182   :  { %v3470_v48 = vpop.permute.xlu1 %627 }
 0x183   :  { %v655_v50 = vmul.f32 %v3404_v43, %v589_v45  ;;  %v3411_v46 = vadd.f32 %v3399_v37, %v561_v47 }
 0x184   :  { %v516_v54 = vpop.f32.mrb[26].mxu0 }
 0x185   :  { %666 = vst [vmem:[#allocation2 + $0x8] sm:$0xff] %v655_v50  ;;  %v590_v55 = vmax.f32 %v3411_v46, 0.0  ;;  %v562_v57 = vadd.f32 %v516_v54, %v369_v56  ;;  %v2254_v58 = vpop.f32.mrb[27].mxu0  ;;  %2312 = vmatmul.mubr.f32.vlgmr.msra.gmra.mrb[22].mxu1 %v655_v50  ;;  %v996_v54 = vld [vmem:[#allocation8 + $0x160] sm:$0xff] }
 0x186   :  { %2791 = vmatpush3.bf16.msra.mxu1 %v2790_v49  ;;  %2314 = vmatprep.mubr.msk.f32.mxu1 %vm3086_vm0, %v3085_v1  ;;  %v1498_v46 = vld [vmem:[#allocation9 + $0x120] sm:$0xff] }
 0x187   :  { %v656_v60 = vmul.f32 %v3414_v59, %v590_v55  ;;  %v3422_v62 = vadd.f32 %v3399_v37, %v562_v57  ;;  %2792 = vmatprep.subr.bf16.mxu1 %v3084_v0  ;;  %v997_v57 = vld [vmem:[#allocation8 + $0x168] sm:$0xff] }
 0x188   :  { %v521_v56 = vpop.f32.mrb[28].mxu0 }
 0x189   :  { %667 = vst [vmem:[#allocation2 + $0x10] sm:$0xff] %v656_v60  ;;  %v591_v5 = vmax.f32 %v3422_v62, 0.0  ;;  %v563_v6 = vadd.f32 %v521_v56, %v3380_v61  ;;  %v2257_v7 = vpop.f32.mrb[29].mxu0  ;;  %2315 = vmatmul.mubr.f32.gmra.mrb[24].mxu1 %v656_v60  ;;  %v991_v61 = vld [vmem:[#allocation8 + $0x138] sm:$0xff]  ;;  %v3485_v56 = vpop.permute.xlu0 %632  ;;  %v1500_v62 = vld [vmem:[#allocation9 + $0x130] sm:$0xff] }
 0x18a   :  { %2317 = vmatprep.mubr.msk.f32.mxu1 %vm3086_vm0, %v3085_v1  ;;  %2794 = vmatpush3.bf16.msra.mxu1 %v2793_v51 }
 0x18b   :  { %v657_v8 = vmul.f32 %v3425_v63, %v591_v5  ;;  %v3435_v10 = vadd.f32 %v3399_v37, %v563_v6  ;;  %2795 = vmatprep.subr.bf16.mxu1 %v3084_v0 }
 0x18c   :  { %v526_v12 = vpop.f32.mrb[30].mxu0  ;;  %v677_v13 = vld [vmem:[#allocation2 + $0x7] sm:$0xff] }
 0x18d   :  { %668 = vst [vmem:[#allocation2 + $0x18] sm:$0xff] %v657_v8  ;;  %v592_v16 = vmax.f32 %v3435_v10, 0.0  ;;  %v564_v17 = vadd.f32 %v526_v12, %v3382_v4  ;;  %v2260_v18 = vpop.f32.mrb[31].mxu0  ;;  %2377 = vmatmul.mubr.f32.vlgmr.msra.gmra.mrb[44].mxu0 %v677_v13  ;;  %2318 = vmatmul.mubr.f32.gmra.mrb[26].mxu1 %v657_v8  ;;  %v2799_v4 = vpack.c.bf16 %v991_v61, %v990_v15  ;;  %v998_v8 = vld [vmem:[#allocation8 + $0x170] sm:$0xff]  ;;  %v3500_v61 = vpop.permute.xlu1 %637 }
 0x18e   :  { %2379 = vmatprep.mubr.msk.f32.mxu0 %vm3086_vm0, %v3085_v1  ;;  %2320 = vmatprep.mubr.msk.f32.mxu1 %vm3086_vm0, %v3085_v1 }
 0x18f   :  { %v658_v21 = vmul.f32 %v3440_v20, %v592_v16  ;;  %v3450_v22 = vadd.f32 %v3399_v37, %v564_v17  ;;  %2797 = vmatpush3.bf16.msra.mxu1 %v2796_v11  ;;  %v999_v11 = vld [vmem:[#allocation8 + $0x178] sm:$0xff] }
 0x190   :  { %v531_v23 = vpop.f32.mrb[32].mxu0  ;;  %v678_v25 = vld [vmem:[#allocation2 + $0xf] sm:$0xff]  ;;  %2798 = vmatprep.subr.bf16.mxu1 %v3084_v0 }
 0x191   :  { %669 = vst [vmem:[#allocation2 + $0x20] sm:$0xff] %v658_v21  ;;  %v593_v28 = vmax.f32 %v3450_v22, 0.0  ;;  %v565_v30 = vadd.f32 %v531_v23, %v3384_v9  ;;  %v2263_v31 = vpop.f32.mrb[33].mxu0  ;;  %2380 = vmatmul.mubr.f32.gmra.mrb[46].mxu0 %v678_v25  ;;  %2321 = vmatmul.mubr.f32.gmra.mrb[28].mxu1 %v658_v21  ;;  %v2802_v9 = vpack.c.bf16 %v993_v27, %v992_v26  ;;  %v3517_v27 = vld [vmem:[#allocation2] sm:$0xff] }
 0x192   :  { %2382 = vmatprep.mubr.msk.f32.mxu0 %vm3086_vm0, %v3085_v1  ;;  %2323 = vmatprep.mubr.msk.f32.mxu1 %vm3086_vm0, %v3085_v1 }
 0x193   :  { %v659_v33 = vmul.f32 %v3455_v32, %v593_v28  ;;  %v3465_v35 = vadd.f32 %v3399_v37, %v565_v30  ;;  %2800 = vmatpush3.bf16.msra.mxu1 %v2799_v4 }
 0x194   :  { %v536_v36 = vpop.f32.mrb[34].mxu0  ;;  %v679_v38 = vld [vmem:[#allocation2 + $0x17] sm:$0xff]  ;;  %2801 = vmatprep.subr.bf16.mxu1 %v3084_v0 }
 0x195   :  { %670 = vst [vmem:[#allocation2 + $0x28] sm:$0xff] %v659_v33  ;;  %v594_v42 = vmax.f32 %v3465_v35, 0.0  ;;  %v566_v44 = vadd.f32 %v536_v36, %v3386_v14  ;;  %v2266_v47 = vpop.f32.mrb[35].mxu0  ;;  %2383 = vmatmul.mubr.f32.gmra.mrb[48].mxu0 %v679_v38  ;;  %2324 = vmatmul.mubr.f32.gmra.mrb[30].mxu1 %v659_v33  ;;  %v2805_v14 = vpack.c.bf16 %v995_v41, %v994_v39  ;;  %v3532_v39 = vpop.permute.xlu1 %647 }
 0x196   :  { %2385 = vmatprep.mubr.msk.f32.mxu0 %vm3086_vm0, %v3085_v1  ;;  %2326 = vmatprep.mubr.msk.f32.mxu1 %vm3086_vm0, %v3085_v1 }
 0x197   :  { %v660_v49 = vmul.f32 %v3470_v48, %v594_v42  ;;  %v3480_v50 = vadd.f32 %v3399_v37, %v566_v44  ;;  %2803 = vmatpush3.bf16.msra.mxu1 %v2802_v9 }
 0x198   :  { %v541_v52 = vpop.f32.mrb[36].mxu0  ;;  %v680_v53 = vld [vmem:[#allocation2 + $0x1f] sm:$0xff]  ;;  %2804 = vmatprep.subr.bf16.mxu1 %v3084_v0 }
 0x199   :  { %671 = vst [vmem:[#allocation2 + $0x30] sm:$0xff] %v660_v49  ;;  %v595_v58 = vmax.f32 %v3480_v50, 0.0  ;;  %v567_v51 = vadd.f32 %v541_v52, %v3388_v19  ;;  %v2269_v60 = vpop.f32.mrb[37].mxu0  ;;  %2386 = vmatmul.mubr.f32.gmra.mrb[50].mxu0 %v680_v53  ;;  %2327 = vmatmul.mubr.f32.gmra.mrb[32].mxu1 %v660_v49  ;;  %v2808_v19 = vpack.c.bf16 %v997_v57, %v996_v54  ;;  %v972_v53 = vld [vmem:[#allocation2 + $0x9] sm:$0xff]  ;;  %v973_v57 = vld [vmem:[#allocation2 + $0x11] sm:$0xff] }
 0x19a   :  { %2388 = vmatprep.mubr.msk.f32.mxu0 %vm3086_vm0, %v3085_v1  ;;  %2329 = vmatprep.mubr.msk.f32.mxu1 %vm3086_vm0, %v3085_v1 }
 0x19b   :  { %v661_v2 = vmul.f32 %v3485_v56, %v595_v58  ;;  %v3495_v3 = vadd.f32 %v3399_v37, %v567_v51  ;;  %2806 = vmatpush3.bf16.msra.mxu1 %v2805_v14  ;;  %v974_v51 = vld [vmem:[#allocation2 + $0x19] sm:$0xff] }
 0x19c   :  { %v546_v6 = vpop.f32.mrb[38].mxu0  ;;  %v681_v7 = vld [vmem:[#allocation2 + $0x27] sm:$0xff]  ;;  %2807 = vmatprep.subr.bf16.mxu1 %v3084_v0 }
 0x19d   :  { %672 = vst [vmem:[#allocation2 + $0x38] sm:$0xff] %v661_v2  ;;  %v596_v12 = vmax.f32 %v3495_v3, 0.0  ;;  %v568_v13 = vadd.f32 %v546_v6, %v3390_v24  ;;  %v2272_v15 = vpop.f32.mrb[39].mxu0  ;;  %2389 = vmatmul.mubr.f32.gmra.mrb[52].mxu0 %v681_v7  ;;  %2330 = vmatmul.mubr.f32.gmra.mrb[34].mxu1 %v661_v2  ;;  %v2811_v24 = vpack.c.bf16 %v999_v11, %v998_v8  ;;  %v975_v60 = vld [vmem:[#allocation2 + $0x21] sm:$0xff] }
 0x19e   :  { %2391 = vmatprep.mubr.msk.f32.mxu0 %vm3086_vm0, %v3085_v1  ;;  %2332 = vmatprep.mubr.msk.f32.mxu1 %vm3086_vm0, %v3085_v1  ;;  %v3515_v1 = vpop.permute.xlu0 %642  ;;  %v1232_v15 = vld [vmem:[#allocation9 + $0x80] sm:$0xff] }
 0x19f   :  { %v662_v17 = vmul.f32 %v3500_v61, %v596_v12  ;;  %v3510_v18 = vadd.f32 %v3399_v37, %v568_v13  ;;  %2809 = vmatpush3.bf16.msra.mxu1 %v2808_v19 }
 0x1a0   :  { %v551_v21 = vpop.f32.mrb[40].mxu0  ;;  %v682_v4 = vld [vmem:[#allocation2 + $0x2f] sm:$0xff]  ;;  %2810 = vmatprep.subr.bf16.mxu1 %v3084_v0 }
 0x1a1   :  { %673 = vst [vmem:[#allocation2 + $0x40] sm:$0xff] %v662_v17  ;;  %v597_v23 = vmax.f32 %v3510_v18, 0.0  ;;  %v569_v25 = vadd.f32 %v551_v21, %v3392_v29  ;;  %v2275_v26 = vpop.f32.mrb[41].mxu0  ;;  %2392 = vmatmul.mubr.f32.gmra.mrb[54].mxu0 %v682_v4  ;;  %2333 = vmatmul.mubr.f32.gmra.mrb[36].mxu1 %v662_v17  ;;  %v976_v2 = vld [vmem:[#allocation2 + $0x29] sm:$0xff]  ;;  %v1233_v17 = vld [vmem:[#allocation9 + $0x88] sm:$0xff]  ;;  %v1234_v21 = vld [vmem:[#allocation9 + $0x90] sm:$0xff] }
 0x1a2   :  { %2394 = vmatprep.mubr.msk.f32.mxu0 %vm3086_vm0, %v3517_v27  ;;  %2335 = vmatprep.mubr.msk.f32.mxu1 %vm3086_vm0, %v3517_v27  ;;  %v3545_v49 = vpop.permute.xlu0 %652  ;;  %v1235_v4 = vld [vmem:[#allocation9 + $0x98] sm:$0xff]  ;;  %v1236_v26 = vld [vmem:[#allocation9 + $0xa0] sm:$0xff] }
 0x1a3   :  { %v663_v30 = vmul.f32 %v3515_v1, %v597_v23  ;;  %v3527_v31 = vadd.f32 %v3399_v37, %v569_v25  ;;  %2812 = vmatpush3.bf16.msra.mxu1 %v2811_v24  ;;  %v2814_v24 = vpack.c.bf16 %v1233_v17, %v1232_v15  ;;  %v2817_v25 = vpack.c.bf16 %v1235_v4, %v1234_v21  ;;  %v1212_v17 = vld [vmem:[#allocation9 + $0x40] sm:$0xff] }
 0x1a4   :  { %v556_v29 = vpop.f32.mrb[42].mxu0  ;;  %v683_v33 = vld [vmem:[#allocation2 + $0x37] sm:$0xff]  ;;  %2837 = vmatprep.subr.bf16.mxu1 %v3084_v0 }
 0x1a5   :  { %674 = vst [vmem:[#allocation2 + $0x48] sm:$0xff] %v663_v30  ;;  %v598_v9 = vmax.f32 %v3527_v31, 0.0  ;;  %v570_v36 = vadd.f32 %v556_v29, %v3394_v34  ;;  %v2278_v38 = vpop.f32.mrb[43].mxu0  ;;  %2395 = vmatmul.mubr.f32.gmra.mrb[56].mxu0 %v683_v33  ;;  %2336 = vmatmul.mubr.f32.gmra.mrb[38].mxu1 %v663_v30  ;;  %v977_v19 = vld [vmem:[#allocation2 + $0x31] sm:$0xff] }
 0x1a6   :  { %2397 = vmatprep.mubr.msk.f32.mxu0 %vm3086_vm0, %v3517_v27  ;;  %2338 = vmatprep.mubr.msk.f32.mxu1 %vm3086_vm0, %v3517_v27  ;;  %v1237_v30 = vld [vmem:[#allocation9 + $0xa8] sm:$0xff]  ;;  %v1204_v29 = vld [vmem:[#allocation9] sm:$0xff] }
 0x1a7   :  { %v664_v41 = vmul.f32 %v3532_v39, %v598_v9  ;;  %v3542_v44 = vadd.f32 %v3399_v37, %v570_v36  ;;  %2815 = vmatpush3.bf16.msra.mxu0 %v2814_v24  ;;  %v2820_v33 = vpack.c.bf16 %v1237_v30, %v1236_v26  ;;  %v1205_v36 = vld [vmem:[#allocation9 + $0x8] sm:$0xff]  ;;  %v1244_v21 = vld [vmem:[#allocation9 + $0xe0] sm:$0xff]  ;;  %v1214_v30 = vld [vmem:[#allocation9 + $0x50] sm:$0xff] }
 0x1a8   :  { %v684_v47 = vld [vmem:[#allocation2 + $0x3f] sm:$0xff]  ;;  %2816 = vmatprep.subr.bf16.mxu0 %v3084_v0  ;;  %v2838_v38 = vpack.c.bf16 %v1205_v36, %v1204_v29  ;;  %v1215_v29 = vld [vmem:[#allocation9 + $0x58] sm:$0xff] }
 0x1a9   :  { %675 = vst [vmem:[#allocation2 + $0x50] sm:$0xff] %v664_v41  ;;  %v599_v34 = vmax.f32 %v3542_v44, 0.0  ;;  %2398 = vmatmul.mubr.f32.gmra.mrb[58].mxu0 %v684_v47  ;;  %2339 = vmatmul.mubr.f32.gmra.mrb[40].mxu1 %v664_v41  ;;  %v978_v6 = vld [vmem:[#allocation2 + $0x39] sm:$0xff]  ;;  %v1207_v47 = vld [vmem:[#allocation9 + $0x18] sm:$0xff]  ;;  %v2853_v36 = vpack.c.bf16 %v1215_v29, %v1214_v30 }
 0x1aa   :  { %2400 = vmatprep.mubr.msk.f32.mxu0 %vm3086_vm0, %v3517_v27  ;;  %2341 = vmatprep.mubr.msk.f32.mxu1 %vm3086_vm0, %v3517_v27  ;;  %v1206_v41 = vld [vmem:[#allocation9 + $0x10] sm:$0xff]  ;;  %v1213_v24 = vld [vmem:[#allocation9 + $0x48] sm:$0xff] }
 0x1ab   :  { %v665_v14 = vmul.f32 %v3545_v49, %v599_v34  ;;  %2818 = vmatpush3.bf16.msra.mxu0 %v2817_v25  ;;  %v2850_v4 = vpack.c.bf16 %v1213_v24, %v1212_v17  ;;  %v1245_v25 = vld [vmem:[#allocation9 + $0xe8] sm:$0xff] }
 0x1ac   :  { %v685_v37 = vld [vmem:[#allocation2 + $0x47] sm:$0xff]  ;;  %2819 = vmatprep.subr.bf16.mxu0 %v3084_v0  ;;  %v2832_v26 = vpack.c.bf16 %v1245_v25, %v1244_v21 }
 0x1ad   :  { %676 = vst [vmem:[#allocation2 + $0x58] sm:$0xff] %v665_v14  ;;  %2401 = vmatmul.mubr.f32.gmra.mrb[60].mxu0 %v685_v37  ;;  %2342 = vmatmul.mubr.f32.gmra.mrb[42].mxu1 %v665_v14  ;;  %v979_v7 = vld [vmem:[#allocation2 + $0x41] sm:$0xff]  ;;  %v2841_v37 = vpack.c.bf16 %v1207_v47, %v1206_v41  ;;  %v1216_v47 = vld [vmem:[#allocation9 + $0x60] sm:$0xff] }
 0x1ae   :  { %2403 = vmatprep.mubr.msk.f32.mxu0 %vm3086_vm0, %v3517_v27  ;;  %2441 = vmatprep.mubr.msk.f32.mxu1 %vm3086_vm0, %v3517_v27  ;;  %v1238_v14 = vld [vmem:[#allocation9 + $0xb0] sm:$0xff] }
 0x1af   :  { %2821 = vmatpush3.bf16.msra.mxu0 %v2820_v33  ;;  %v1246_v33 = vld [vmem:[#allocation9 + $0xf0] sm:$0xff] }
 0x1b0   :  { %v686_v52 = vld [vmem:[#allocation2 + $0x4f] sm:$0xff]  ;;  %2822 = vmatprep.subr.bf16.mxu0 %v3084_v0 }
 0x1b1   :  { %2404 = vmatmul.mubr.f32.gmra.mrb[62].mxu0 %v686_v52  ;;  %2442 = vmatmul.mubr.f32.vlgmr.msra.gmra.mrb[44].mxu1 %v972_v53  ;;  %v980_v8 = vld [vmem:[#allocation2 + $0x49] sm:$0xff] }
 0x1b2   :  { %2406 = vmatprep.mubr.msk.f32.mxu0 %vm3086_vm0, %v3517_v27  ;;  %2444 = vmatprep.mubr.msk.f32.mxu1 %vm3086_vm0, %v3517_v27  ;;  %v1239_v52 = vld [vmem:[#allocation9 + $0xb8] sm:$0xff] }
 0x1b3   :  { %2839 = vmatpush3.bf16.msra.mxu1 %v2838_v38  ;;  %v2823_v53 = vpack.c.bf16 %v1239_v52, %v1238_v14  ;;  %v1247_v38 = vld [vmem:[#allocation9 + $0xf8] sm:$0xff]  ;;  %v1217_v14 = vld [vmem:[#allocation9 + $0x68] sm:$0xff]  ;;  %v1218_v52 = vld [vmem:[#allocation9 + $0x70] sm:$0xff] }
 0x1b4   :  { %v687_v54 = vld [vmem:[#allocation2 + $0x57] sm:$0xff]  ;;  %2840 = vmatprep.subr.bf16.mxu1 %v3084_v0  ;;  %v2835_v41 = vpack.c.bf16 %v1247_v38, %v1246_v33 }
 0x1b5   :  { %2407 = vmatmul.mubr.f32.gmra.mrb[64].mxu0 %v687_v54  ;;  %2445 = vmatmul.mubr.f32.gmra.mrb[46].mxu1 %v973_v57  ;;  %v981_v11 = vld [vmem:[#allocation2 + $0x51] sm:$0xff]  ;;  %v982_v13 = vld [vmem:[#allocation2 + $0x59] sm:$0xff] }
 0x1b6   :  { %2447 = vmatprep.mubr.msk.f32.mxu1 %vm3086_vm0, %v3517_v27  ;;  %2506 = vmatprep.mubr.msk.f32.mxu0 %vm3086_vm0, %v3517_v27  ;;  %v1208_v54 = vld [vmem:[#allocation9 + $0x20] sm:$0xff]  ;;  %v1209_v57 = vld [vmem:[#allocation9 + $0x28] sm:$0xff] }
 0x1b7   :  { %2842 = vmatpush3.bf16.msra.mxu1 %v2841_v37  ;;  %2824 = vmatpush3.bf16.msra.mxu0 %v2823_v53  ;;  %v2856_v37 = vpack.c.bf16 %v1217_v14, %v1216_v47  ;;  %v1219_v53 = vld [vmem:[#allocation9 + $0x78] sm:$0xff] }
 0x1b8   :  { %2843 = vmatprep.subr.bf16.mxu1 %v3084_v0  ;;  %2825 = vmatprep.subr.bf16.mxu0 %v3084_v0 }
 0x1b9   :  { %2448 = vmatmul.mubr.f32.gmra.mrb[48].mxu1 %v974_v51  ;;  %v1240_v51 = vld [vmem:[#allocation9 + $0xc0] sm:$0xff] }
 0x1ba   :  { %2450 = vmatprep.mubr.msk.f32.mxu1 %vm3086_vm0, %v3517_v27 }
 0x1bd   :  { %2451 = vmatmul.mubr.f32.gmra.mrb[50].mxu1 %v975_v60  ;;  %v2844_v60 = vpack.c.bf16 %v1209_v57, %v1208_v54  ;;  %v2859_v54 = vpack.c.bf16 %v1219_v53, %v1218_v52 }
 0x1be   :  { %2453 = vmatprep.mubr.msk.f32.mxu1 %vm3086_vm0, %v3517_v27 }
 0x1bf   :  { %2845 = vmatpush3.bf16.msra.mxu1 %v2844_v60 }
 0x1c0   :  { %2846 = vmatprep.subr.bf16.mxu1 %v3084_v0 }
 0x1c1   :  { %2454 = vmatmul.mubr.f32.gmra.mrb[52].mxu1 %v976_v2  ;;  %v1241_v2 = vld [vmem:[#allocation9 + $0xc8] sm:$0xff] }
 0x1c2   :  { %2456 = vmatprep.mubr.msk.f32.mxu1 %vm3086_vm0, %v3517_v27 }
 0x1c5   :  { %2457 = vmatmul.mubr.f32.gmra.mrb[54].mxu1 %v977_v19  ;;  %v2826_v19 = vpack.c.bf16 %v1241_v2, %v1240_v51 }
 0x1c6   :  { %2459 = vmatprep.mubr.msk.f32.mxu1 %vm3086_vm0, %v3517_v27 }
 0x1c7   :  { %2827 = vmatpush3.bf16.msra.mxu0 %v2826_v19 }
 0x1c8   :  { %2828 = vmatprep.subr.bf16.mxu0 %v3084_v0 }
 0x1c9   :  { %2460 = vmatmul.mubr.f32.gmra.mrb[56].mxu1 %v978_v6  ;;  %v1210_v6 = vld [vmem:[#allocation9 + $0x30] sm:$0xff] }
 0x1ca   :  { %2462 = vmatprep.mubr.msk.f32.mxu1 %vm3086_vm0, %v3517_v27 }
 0x1cd   :  { %2463 = vmatmul.mubr.f32.gmra.mrb[58].mxu1 %v979_v7  ;;  %v1211_v7 = vld [vmem:[#allocation9 + $0x38] sm:$0xff] }
 0x1ce   :  { %2465 = vmatprep.mubr.msk.f32.mxu1 %vm3086_vm0, %v3517_v27 }
 0x1d1   :  { %2466 = vmatmul.mubr.f32.gmra.mrb[60].mxu1 %v980_v8  ;;  %v1242_v8 = vld [vmem:[#allocation9 + $0xd0] sm:$0xff] }
 0x1d2   :  { %2468 = vmatprep.mubr.msk.f32.mxu1 %vm3086_vm0, %v3517_v27 }
 0x1d5   :  { %2469 = vmatmul.mubr.f32.gmra.mrb[62].mxu1 %v981_v11  ;;  %v2847_v11 = vpack.c.bf16 %v1211_v7, %v1210_v6 }
 0x1d6   :  { %2471 = vmatprep.mubr.msk.f32.mxu1 %vm3086_vm0, %v3517_v27 }
 0x1d7   :  { %2848 = vmatpush3.bf16.msra.mxu1 %v2847_v11 }
 0x1d8   :  { %2849 = vmatprep.subr.bf16.mxu1 %v3084_v0 }
 0x1d9   :  { %2472 = vmatmul.mubr.f32.gmra.mrb[64].mxu1 %v982_v13  ;;  %v1243_v13 = vld [vmem:[#allocation9 + $0xd8] sm:$0xff] }
 0x1da   :  { %2571 = vmatprep.mubr.msk.f32.mxu1 %vm3086_vm0, %v3517_v27  ;;  %v2829_v15 = vpack.c.bf16 %v1243_v13, %v1242_v8 }
 0x1db   :  { %2851 = vmatpush3.bf16.msra.mxu1 %v2850_v4 }
 0x1dc   :  { %2830 = vmatpush3.bf16.msra.mxu0 %v2829_v15  ;;  %2852 = vmatprep.subr.bf16.mxu1 %v3084_v0 }
 0x1dd   :  { %2831 = vmatprep.subr.bf16.mxu0 %v3084_v0 }
 0x1df   :  { %2854 = vmatpush3.bf16.msra.mxu1 %v2853_v36 }
 0x1e0   :  { %2833 = vmatpush3.bf16.msra.mxu0 %v2832_v26  ;;  %2855 = vmatprep.subr.bf16.mxu1 %v3084_v0 }
 0x1e1   :  { %2834 = vmatprep.subr.bf16.mxu0 %v3084_v0 }
 0x1e3   :  { %2857 = vmatpush3.bf16.msra.mxu1 %v2856_v37 }
 0x1e4   :  { %2836 = vmatpush3.bf16.msra.mxu0 %v2835_v41  ;;  %2858 = vmatprep.subr.bf16.mxu1 %v3084_v0 }
 0x1e5   :  { %2861 = vmatprep.subr.bf16.mxu0 %v3084_v0 }
 0x1e7   :  { %2860 = vmatpush3.bf16.msra.mxu1 %v2859_v54 }
 0x258   :  { %v798_v57 = vpop.f32.mrb[22].mxu1 }
 0x259   :  { %v2313_v51 = vpop.f32.mrb[23].mxu1 }
 0x25c   :  { %v803_v60 = vpop.f32.mrb[24].mxu1 }
 0x25d   :  { %v2316_v2 = vpop.f32.mrb[25].mxu1 }
 0x260   :  { %v918_v19 = vpop.f32.mrb[44].mxu0  ;;  %v808_v6 = vpop.f32.mrb[26].mxu1 }
 0x261   :  { %v919_v7 = vadd.f32 %v918_v19, %v798_v57  ;;  %v2378_v8 = vpop.f32.mrb[45].mxu0  ;;  %v2319_v11 = vpop.f32.mrb[27].mxu1 }
 0x264   :  { %v923_v13 = vpop.f32.mrb[46].mxu0  ;;  %v813_v15 = vpop.f32.mrb[28].mxu1 }
 0x265   :  { %v924_v17 = vadd.f32 %v923_v13, %v803_v60  ;;  %v2381_v24 = vpop.f32.mrb[47].mxu0  ;;  %v2322_v21 = vpop.f32.mrb[29].mxu1 }
 0x268   :  { %v928_v4 = vpop.f32.mrb[48].mxu0  ;;  %v818_v25 = vpop.f32.mrb[30].mxu1 }
 0x269   :  { %v929_v26 = vadd.f32 %v928_v4, %v808_v6  ;;  %v2384_v30 = vpop.f32.mrb[49].mxu0  ;;  %v2325_v29 = vpop.f32.mrb[31].mxu1 }
 0x26c   :  { %v933_v33 = vpop.f32.mrb[50].mxu0  ;;  %v823_v36 = vpop.f32.mrb[32].mxu1 }
 0x26d   :  { %v3599_v38 = vadd.f32 %v933_v33, %v813_v15  ;;  %v2387_v41 = vpop.f32.mrb[51].mxu0  ;;  %v2328_v47 = vpop.f32.mrb[33].mxu1 }
 0x270   :  { %v938_v14 = vpop.f32.mrb[52].mxu0  ;;  %v828_v37 = vpop.f32.mrb[34].mxu1 }
 0x271   :  { %v3601_v52 = vadd.f32 %v938_v14, %v818_v25  ;;  %v2390_v53 = vpop.f32.mrb[53].mxu0  ;;  %v2331_v54 = vpop.f32.mrb[35].mxu1 }
 0x274   :  { %v943_v57 = vpop.f32.mrb[54].mxu0  ;;  %v833_v51 = vpop.f32.mrb[36].mxu1 }
 0x275   :  { %v3603_v60 = vadd.f32 %v943_v57, %v823_v36  ;;  %v2393_v2 = vpop.f32.mrb[55].mxu0  ;;  %v2334_v19 = vpop.f32.mrb[37].mxu1 }
 0x278   :  { %v948_v6 = vpop.f32.mrb[56].mxu0  ;;  %v838_v8 = vpop.f32.mrb[38].mxu1 }
 0x279   :  { %v3605_v11 = vadd.f32 %v948_v6, %v828_v37  ;;  %v2396_v13 = vpop.f32.mrb[57].mxu0  ;;  %v2337_v15 = vpop.f32.mrb[39].mxu1  ;;  %v3614_v37 = vld [vmem:[%s3799_s4] ss:$0 sm:$0xff] }
 0x27c   :  { %v953_v24 = vpop.f32.mrb[58].mxu0  ;;  %v843_v21 = vpop.f32.mrb[40].mxu1 }
 0x27d   :  { %v3607_v4 = vadd.f32 %v953_v24, %v833_v51  ;;  %v2399_v25 = vpop.f32.mrb[59].mxu0  ;;  %v2340_v30 = vpop.f32.mrb[41].mxu1 }
 0x280   :  { %v958_v29 = vpop.f32.mrb[60].mxu0  ;;  %v848_v33 = vpop.f32.mrb[42].mxu1 }
 0x281   :  { %v3609_v41 = vadd.f32 %v958_v29, %v838_v8  ;;  %v2402_v36 = vpop.f32.mrb[61].mxu0  ;;  %v2343_v47 = vpop.f32.mrb[43].mxu1  ;;  %v1494_v29 = vld [vmem:[#allocation9 + $0x100] sm:$0xff] }
 0x282   :  { %v1495_v36 = vld [vmem:[#allocation9 + $0x108] sm:$0xff] }
 0x284   :  { %v963_v14 = vpop.f32.mrb[62].mxu0  ;;  %v1066_v53 = vpop.f32.mrb[44].mxu1 }
 0x285   :  { %v3616_v54 = vadd.f32 %v963_v14, %v843_v21  ;;  %v2405_v57 = vpop.f32.mrb[63].mxu0  ;;  %v1120_v51 = vadd.f32 %v1066_v53, %v919_v7  ;;  %v2443_v2 = vpop.f32.mrb[45].mxu1  ;;  %v2862_v14 = vpack.c.bf16 %v1495_v36, %v1494_v29 }
 0x286   :  { %v1496_v2 = vld [vmem:[#allocation9 + $0x110] sm:$0xff] }
 0x287   :  { %v1138_v19 = vadd.f32 %v3614_v37, %v1120_v51 }
 0x288   :  { %v968_v6 = vpop.f32.mrb[64].mxu0  ;;  %v1071_v13 = vpop.f32.mrb[46].mxu1 }
 0x289   :  { %v3619_v8 = vadd.f32 %v968_v6, %v848_v33  ;;  %v2408_v15 = vpop.f32.mrb[65].mxu0  ;;  %v1149_v24 = vmax.f32 %v1138_v19, 0.0  ;;  %v1121_v25 = vadd.f32 %v1071_v13, %v924_v17  ;;  %v2446_v30 = vpop.f32.mrb[47].mxu1  ;;  %v1497_v19 = vld [vmem:[#allocation9 + $0x118] sm:$0xff] }
 0x28a   :  { %v2865_v6 = vpack.c.bf16 %v1497_v19, %v1496_v2  ;;  %v1502_v2 = vld [vmem:[#allocation9 + $0x140] sm:$0xff]  ;;  %v1503_v19 = vld [vmem:[#allocation9 + $0x148] sm:$0xff] }
 0x28b   :  { %v3623_v47 = vadd.f32 %v1149_v24, %v589_v45  ;;  %v1139_v21 = vadd.f32 %v3614_v37, %v1121_v25 }
 0x28c   :  { %v1076_v7 = vpop.f32.mrb[48].mxu1 }
 0x28d   :  { %v1171_v53 = vmul.f32 %v3623_v47, %v3404_v43  ;;  %v1150_v57 = vmax.f32 %v1139_v21, 0.0  ;;  %v1122_v33 = vadd.f32 %v1076_v7, %v929_v26  ;;  %v2449_v51 = vpop.f32.mrb[49].mxu1 }
 0x28f   :  { %1182 = vst [vmem:[#allocation2 + $0x8] sm:$0xff] %v1171_v53  ;;  %v3630_v17 = vadd.f32 %v1150_v57, %v590_v55  ;;  %v1140_v40 = vadd.f32 %v3614_v37, %v1122_v33  ;;  %2507 = vmatmul.mubr.f32.vlgmr.msra.gmra.mrb[66].mxu0 %v1171_v53  ;;  %v1499_v55 = vld [vmem:[#allocation9 + $0x128] sm:$0xff] }
 0x290   :  { %v1081_v45 = vpop.f32.mrb[50].mxu1  ;;  %2863 = vmatpush3.bf16.msra.mxu0 %v2862_v14  ;;  %2509 = vmatprep.mubr.msk.f32.mxu0 %vm3086_vm0, %v3517_v27  ;;  %v2868_v21 = vpack.c.bf16 %v1499_v55, %v1498_v46 }
 0x291   :  { %v1172_v43 = vmul.f32 %v3630_v17, %v3414_v59  ;;  %v1151_v26 = vmax.f32 %v1140_v40, 0.0  ;;  %v1123_v13 = vadd.f32 %v1081_v45, %v3599_v38  ;;  %v2452_v15 = vpop.f32.mrb[51].mxu1  ;;  %2864 = vmatprep.subr.bf16.mxu0 %v3084_v0 }
 0x292   :  { %v1505_v15 = vld [vmem:[#allocation9 + $0x158] sm:$0xff] }
 0x293   :  { %1183 = vst [vmem:[#allocation2 + $0x10] sm:$0xff] %v1172_v43  ;;  %v1162_v24 = vadd.f32 %v1151_v26, %v591_v5  ;;  %v1141_v25 = vadd.f32 %v3614_v37, %v1123_v13  ;;  %2510 = vmatmul.mubr.f32.gmra.mrb[68].mxu0 %v1172_v43  ;;  %v1501_v5 = vld [vmem:[#allocation9 + $0x138] sm:$0xff]  ;;  %v1504_v13 = vld [vmem:[#allocation9 + $0x150] sm:$0xff] }
 0x294   :  { %v1086_v30 = vpop.f32.mrb[52].mxu1  ;;  %2512 = vmatprep.mubr.msk.f32.mxu0 %vm3086_vm0, %v3517_v27  ;;  %2866 = vmatpush3.bf16.msra.mxu0 %v2865_v6  ;;  %v2877_v35 = vpack.c.bf16 %v1505_v15, %v1504_v13 }
 0x295   :  { %v1173_v59 = vmul.f32 %v1162_v24, %v3425_v63  ;;  %v1152_v38 = vmax.f32 %v1141_v25, 0.0  ;;  %v1124_v29 = vadd.f32 %v1086_v30, %v3601_v52  ;;  %v2455_v36 = vpop.f32.mrb[53].mxu1  ;;  %2867 = vmatprep.subr.bf16.mxu0 %v3084_v0 }
 0x296   :  { %v1193_v7 = vld [vmem:[#allocation2 + $0x7] sm:$0xff] }
 0x297   :  { %1184 = vst [vmem:[#allocation2 + $0x18] sm:$0xff] %v1173_v59  ;;  %v3649_v14 = vadd.f32 %v1152_v38, %v592_v16  ;;  %v1142_v53 = vadd.f32 %v3614_v37, %v1124_v29  ;;  %2572 = vmatmul.mubr.f32.vlgmr.msra.gmra.mrb[66].mxu1 %v1193_v7  ;;  %2513 = vmatmul.mubr.f32.gmra.mrb[70].mxu0 %v1173_v59  ;;  %v1506_v59 = vld [vmem:[#allocation9 + $0x160] sm:$0xff]  ;;  %v1507_v38 = vld [vmem:[#allocation9 + $0x168] sm:$0xff] }
 0x298   :  { %v1091_v63 = vpop.f32.mrb[54].mxu1  ;;  %2574 = vmatprep.mubr.msk.f32.mxu1 %vm3086_vm0, %v3517_v27  ;;  %2515 = vmatprep.mubr.msk.f32.mxu0 %vm3086_vm0, %v3517_v27  ;;  %v2871_v16 = vpack.c.bf16 %v1501_v5, %v1500_v62  ;;  %v1508_v5 = vld [vmem:[#allocation9 + $0x170] sm:$0xff] }
 0x299   :  { %v1174_v52 = vmul.f32 %v3649_v14, %v3440_v20  ;;  %v1153_v57 = vmax.f32 %v1142_v53, 0.0  ;;  %v1125_v33 = vadd.f32 %v1091_v63, %v3603_v60  ;;  %v2458_v10 = vpop.f32.mrb[55].mxu1  ;;  %2869 = vmatpush3.bf16.msra.mxu0 %v2868_v21  ;;  %v1509_v53 = vld [vmem:[#allocation9 + $0x178] sm:$0xff] }
 0x29a   :  { %v1194_v51 = vld [vmem:[#allocation2 + $0xf] sm:$0xff]  ;;  %2870 = vmatprep.subr.bf16.mxu0 %v3084_v0 }
 0x29b   :  { %1185 = vst [vmem:[#allocation2 + $0x20] sm:$0xff] %v1174_v52  ;;  %v3662_v40 = vadd.f32 %v1153_v57, %v593_v28  ;;  %v1143_v45 = vadd.f32 %v3614_v37, %v1125_v33  ;;  %2575 = vmatmul.mubr.f32.gmra.mrb[68].mxu1 %v1194_v51  ;;  %2516 = vmatmul.mubr.f32.gmra.mrb[72].mxu0 %v1174_v52  ;;  %v1482_v44 = vld [vmem:[#allocation2 + $0x9] sm:$0xff] }
 0x29c   :  { %v1096_v20 = vpop.f32.mrb[56].mxu1  ;;  %2577 = vmatprep.mubr.msk.f32.mxu1 %vm3086_vm0, %v3517_v27  ;;  %2518 = vmatprep.mubr.msk.f32.mxu0 %vm3086_vm0, %v3517_v27  ;;  %v2874_v28 = vpack.c.bf16 %v1503_v19, %v1502_v2 }
 0x29d   :  { %v1175_v60 = vmul.f32 %v3662_v40, %v3455_v32  ;;  %v1154_v6 = vmax.f32 %v1143_v45, 0.0  ;;  %v1126_v43 = vadd.f32 %v1096_v20, %v3605_v11  ;;  %v2461_v22 = vpop.f32.mrb[57].mxu1  ;;  %2872 = vmatpush3.bf16.msra.mxu0 %v2871_v16 }
 0x29e   :  { %v1195_v26 = vld [vmem:[#allocation2 + $0x17] sm:$0xff]  ;;  %2873 = vmatprep.subr.bf16.mxu0 %v3084_v0 }
 0x29f   :  { %1186 = vst [vmem:[#allocation2 + $0x28] sm:$0xff] %v1175_v60  ;;  %v1165_v46 = vadd.f32 %v1154_v6, %v594_v42  ;;  %v1144_v55 = vadd.f32 %v3614_v37, %v1126_v43  ;;  %2578 = vmatmul.mubr.f32.gmra.mrb[70].mxu1 %v1195_v26  ;;  %2519 = vmatmul.mubr.f32.gmra.mrb[74].mxu0 %v1175_v60 }
 0x2a0   :  { %v1101_v32 = vpop.f32.mrb[58].mxu1  ;;  %2580 = vmatprep.mubr.msk.f32.mxu1 %vm3086_vm0, %v3517_v27  ;;  %2521 = vmatprep.mubr.msk.f32.mxu0 %vm3086_vm0, %v3517_v27 }
 0x2a1   :  { %v1176_v11 = vmul.f32 %v1165_v46, %v3470_v48  ;;  %v1155_v24 = vmax.f32 %v1144_v55, 0.0  ;;  %v1127_v25 = vadd.f32 %v1101_v32, %v3607_v4  ;;  %v2464_v30 = vpop.f32.mrb[59].mxu1  ;;  %2875 = vmatpush3.bf16.msra.mxu0 %v2874_v28  ;;  %v1671_v55 = vld [vmem:[#allocation11 + $0x8] sm:$0xff]  ;;  %v1673_v32 = vld [vmem:[#allocation11 + $0x18] sm:$0xff] }
 0x2a2   :  { %v1196_v42 = vld [vmem:[#allocation2 + $0x1f] sm:$0xff]  ;;  %2876 = vmatprep.subr.bf16.mxu0 %v3084_v0 }
 0x2a3   :  { %1187 = vst [vmem:[#allocation2 + $0x30] sm:$0xff] %v1176_v11  ;;  %v3685_v29 = vadd.f32 %v1155_v24, %v595_v58  ;;  %v1145_v36 = vadd.f32 %v3614_v37, %v1127_v25  ;;  %2581 = vmatmul.mubr.f32.gmra.mrb[72].mxu1 %v1196_v42  ;;  %2522 = vmatmul.mubr.f32.gmra.mrb[76].mxu0 %v1176_v11  ;;  %v1484_v60 = vld [vmem:[#allocation2 + $0x19] sm:$0xff]  ;;  %v1670_v24 = vld [vmem:[#allocation11] sm:$0xff]  ;;  %v1677_v42 = vld [vmem:[#allocation11 + $0x38] sm:$0xff] }
 0x2a4   :  { %v1106_v48 = vpop.f32.mrb[60].mxu1  ;;  %2583 = vmatprep.mubr.msk.f32.mxu1 %vm3086_vm0, %v3517_v27  ;;  %2524 = vmatprep.mubr.msk.f32.mxu0 %vm3086_vm0, %v3517_v27  ;;  %v2880_v58 = vpack.c.bf16 %v1507_v38, %v1506_v59  ;;  %v2885_v11 = vpack.c.bf16 %v1673_v32, %v1671_v55  ;;  %v1672_v25 = vld [vmem:[#allocation11 + $0x10] sm:$0xff]  ;;  %v1674_v38 = vld [vmem:[#allocation11 + $0x20] sm:$0xff] }
 0x2a5   :  { %v1177_v4 = vmul.f32 %v3685_v29, %v3485_v56  ;;  %v1156_v21 = vmax.f32 %v1145_v36, 0.0  ;;  %v1128_v7 = vadd.f32 %v1106_v48, %v3609_v41  ;;  %v2467_v50 = vpop.f32.mrb[61].mxu1  ;;  %2878 = vmatpush3.bf16.msra.mxu0 %v2877_v35  ;;  %v2887_v30 = vpack.c.bf16 %v1672_v25, %v1670_v24  ;;  %v1675_v35 = vld [vmem:[#allocation11 + $0x28] sm:$0xff]  ;;  %v1676_v36 = vld [vmem:[#allocation11 + $0x30] sm:$0xff] }
 0x2a6   :  { %v1197_v62 = vld [vmem:[#allocation2 + $0x27] sm:$0xff]  ;;  %2879 = vmatprep.subr.bf16.mxu0 %v3084_v0  ;;  %2886 = vmatprep.subr.bf16.mxu1 %v2885_v11  ;;  %v2889_v59 = vpack.c.bf16 %v1677_v42, %v1675_v35  ;;  %v2891_v48 = vpack.c.bf16 %v1676_v36, %v1674_v38 }
 0x2a7   :  { %1188 = vst [vmem:[#allocation2 + $0x38] sm:$0xff] %v1177_v4  ;;  %v3698_v63 = vadd.f32 %v1156_v21, %v596_v12  ;;  %v1146_v52 = vadd.f32 %v3614_v37, %v1128_v7  ;;  %2584 = vmatmul.mubr.f32.gmra.mrb[74].mxu1 %v1197_v62  ;;  %2525 = vmatmul.mubr.f32.gmra.mrb[78].mxu0 %v1177_v4  ;;  %v1485_v6 = vld [vmem:[#allocation2 + $0x21] sm:$0xff]  ;;  %v1679_v4 = vld [vmem:[#allocation11 + $0x48] sm:$0xff]  ;;  %v1678_v7 = vld [vmem:[#allocation11 + $0x40] sm:$0xff] }
 0x2a8   :  { %v1111_v56 = vpop.f32.mrb[62].mxu1  ;;  %2586 = vmatprep.mubr.msk.f32.mxu1 %vm3086_vm0, %v3517_v27  ;;  %2527 = vmatprep.mubr.msk.f32.mxu0 %vm3086_vm0, %v3517_v27  ;;  %v2883_v12 = vpack.c.bf16 %v1509_v53, %v1508_v5  ;;  %v1680_v50 = vld [vmem:[#allocation11 + $0x50] sm:$0xff]  ;;  %v1683_v62 = vld [vmem:[#allocation11 + $0x68] sm:$0xff]  ;;  %v1685_v5 = vld [vmem:[#allocation11 + $0x78] sm:$0xff] }
 0x2a9   :  { %v1178_v41 = vmul.f32 %v3698_v63, %v3500_v61  ;;  %v1157_v57 = vmax.f32 %v1146_v52, 0.0  ;;  %v1129_v33 = vadd.f32 %v1111_v56, %v3616_v54  ;;  %v2470_v3 = vpop.f32.mrb[63].mxu1  ;;  %2881 = vmatpush3.bf16.msra.mxu0 %v2880_v58  ;;  %2888 = vmatpush1.bf16.msra.mxu1 %v2887_v30  ;;  %v2895_v58 = vpack.c.bf16 %v1680_v50, %v1678_v7  ;;  %v1682_v52 = vld [vmem:[#allocation11 + $0x60] sm:$0xff]  ;;  %v1684_v56 = vld [vmem:[#allocation11 + $0x70] sm:$0xff] }
 0x2aa   :  { %v1198_v10 = vld [vmem:[#allocation2 + $0x2f] sm:$0xff]  ;;  %2882 = vmatprep.subr.bf16.mxu0 %v3084_v0  ;;  %2890 = vmatprep.subr.bf16.mxu1 %v2889_v59  ;;  %v2897_v53 = vpack.c.bf16 %v1685_v5, %v1683_v62 }
 0x2ab   :  { %1189 = vst [vmem:[#allocation2 + $0x40] sm:$0xff] %v1178_v41  ;;  %v1168_v16 = vadd.f32 %v1157_v57, %v597_v23  ;;  %v1147_v51 = vadd.f32 %v3614_v37, %v1129_v33  ;;  %2587 = vmatmul.mubr.f32.gmra.mrb[76].mxu1 %v1198_v10  ;;  %2528 = vmatmul.mubr.f32.gmra.mrb[80].mxu0 %v1178_v41  ;;  %v1486_v43 = vld [vmem:[#allocation2 + $0x29] sm:$0xff]  ;;  %v1687_v57 = vld [vmem:[#allocation11 + $0x88] sm:$0xff]  ;;  %v1688_v10 = vld [vmem:[#allocation11 + $0x90] sm:$0xff] }
 0x2ac   :  { %v1116_v2 = vpop.f32.mrb[64].mxu1  ;;  %2589 = vmatprep.mubr.msk.f32.mxu1 %vm3086_vm0, %v3517_v27  ;;  %2530 = vmatprep.mubr.msk.f32.mxu0 %vm3086_vm0, %v3517_v27  ;;  %v2899_v41 = vpack.c.bf16 %v1684_v56, %v1682_v52  ;;  %v1689_v33 = vld [vmem:[#allocation11 + $0x98] sm:$0xff] }
 0x2ad   :  { %v1179_v61 = vmul.f32 %v1168_v16, %v3515_v1  ;;  %v1158_v54 = vmax.f32 %v1147_v51, 0.0  ;;  %v1130_v0 = vadd.f32 %v1116_v2, %v3619_v8  ;;  %v2473_v19 = vpop.f32.mrb[65].mxu1  ;;  %2884 = vmatpush3.bf16.msra.mxu0 %v2883_v12  ;;  %2892 = vmatpush1.bf16.msra.mxu1 %v2891_v48  ;;  %v2901_v3 = vpack.c.bf16 %v1689_v33, %v1687_v57  ;;  %v1686_v12 = vld [vmem:[#allocation11 + $0x80] sm:$0xff]  ;;  %v1691_v51 = vld [vmem:[#allocation11 + $0xa8] sm:$0xff]  ;;  %v1693_v2 = vld [vmem:[#allocation11 + $0xb8] sm:$0xff] }
 0x2ae   :  { %v1199_v18 = vld [vmem:[#allocation2 + $0x37] sm:$0xff]  ;;  %v2903_v16 = vpack.c.bf16 %v1688_v10, %v1686_v12 }
 0x2af   :  { %1190 = vst [vmem:[#allocation2 + $0x48] sm:$0xff] %v1179_v61  ;;  %v3720_v23 = vadd.f32 %v1158_v54, %v598_v9  ;;  %v1148_v45 = vadd.f32 %v3614_v37, %v1130_v0  ;;  %2590 = vmatmul.mubr.f32.gmra.mrb[78].mxu1 %v1199_v18  ;;  %2531 = vmatmul.mubr.f32.gmra.mrb[82].mxu0 %v1179_v61  ;;  %v1487_v22 = vld [vmem:[#allocation2 + $0x31] sm:$0xff]  ;;  %v1692_v0 = vld [vmem:[#allocation11 + $0xb0] sm:$0xff] }
 0x2b0   :  { %2592 = vmatprep.mubr.msk.f32.mxu1 %vm3086_vm0, %v3517_v27  ;;  %2533 = vmatprep.mubr.msk.f32.mxu0 %vm3086_vm0, %v3517_v27  ;;  %v2905_v61 = vpack.c.bf16 %v1693_v2, %v1691_v51  ;;  %v1690_v54 = vld [vmem:[#allocation11 + $0xa0] sm:$0xff]  ;;  %v1695_v18 = vld [vmem:[#allocation11 + $0xc8] sm:$0xff] }
 0x2b1   :  { %v1180_v1 = vmul.f32 %v3720_v23, %v3532_v39  ;;  %v1159_v8 = vmax.f32 %v1148_v45, 0.0  ;;  %v2907_v19 = vpack.c.bf16 %v1692_v0, %v1690_v54  ;;  %v1697_v45 = vld [vmem:[#allocation11 + $0xd8] sm:$0xff] }
 0x2b2   :  { %v1200_v20 = vld [vmem:[#allocation2 + $0x3f] sm:$0xff] }
 0x2b3   :  { %1191 = vst [vmem:[#allocation2 + $0x50] sm:$0xff] %v1180_v1  ;;  %v3731_v31 = vadd.f32 %v1159_v8, %v599_v34  ;;  %2593 = vmatmul.mubr.f32.gmra.mrb[80].mxu1 %v1200_v20  ;;  %2534 = vmatmul.mubr.f32.gmra.mrb[84].mxu0 %v1180_v1  ;;  %v1488_v28 = vld [vmem:[#allocation2 + $0x39] sm:$0xff]  ;;  %v2909_v1 = vpack.c.bf16 %v1697_v45, %v1695_v18  ;;  %v1694_v8 = vld [vmem:[#allocation11 + $0xc0] sm:$0xff] }
 0x2b4   :  { %2595 = vmatprep.mubr.msk.f32.mxu1 %vm3086_vm0, %v3517_v27  ;;  %2536 = vmatprep.mubr.msk.f32.mxu0 %vm3086_vm0, %v3517_v27  ;;  %v1696_v20 = vld [vmem:[#allocation11 + $0xd0] sm:$0xff] }
 0x2b5   :  { %v1181_v9 = vmul.f32 %v3731_v31, %v3545_v49  ;;  %v1483_v49 = vld [vmem:[#allocation2 + $0x11] sm:$0xff] }
 0x2b6   :  { %v1201_v37 = vld [vmem:[#allocation2 + $0x47] sm:$0xff] }
 0x2b7   :  { %1192 = vst [vmem:[#allocation2 + $0x58] sm:$0xff] %v1181_v9  ;;  %2596 = vmatmul.mubr.f32.gmra.mrb[82].mxu1 %v1201_v37  ;;  %2537 = vmatmul.mubr.f32.gmra.mrb[86].mxu0 %v1181_v9  ;;  %v1489_v26 = vld [vmem:[#allocation2 + $0x41] sm:$0xff]  ;;  %v2911_v9 = vpack.c.bf16 %v1696_v20, %v1694_v8  ;;  %v1699_v37 = vld [vmem:[#allocation11 + $0xe8] sm:$0xff] }
 0x2b8   :  { %2598 = vmatprep.mubr.msk.f32.mxu1 %vm3086_vm0, %v3517_v27  ;;  %2636 = vmatprep.mubr.msk.f32.mxu0 %vm3086_vm0, %v3517_v27 }
 0x2ba   :  { %v1202_v39 = vld [vmem:[#allocation2 + $0x4f] sm:$0xff] }
 0x2bb   :  { %2599 = vmatmul.mubr.f32.gmra.mrb[84].mxu1 %v1202_v39  ;;  %2637 = vmatmul.mubr.f32.vlgmr.msra.gmra.mrb[88].mxu0 %v1482_v44  ;;  %v1490_v13 = vld [vmem:[#allocation2 + $0x49] sm:$0xff] }
 0x2bc   :  { %2601 = vmatprep.mubr.msk.f32.mxu1 %vm3086_vm0, %v3517_v27  ;;  %2639 = vmatprep.mubr.msk.f32.mxu0 %vm3086_vm0, %v3517_v27  ;;  %v1701_v39 = vld [vmem:[#allocation11 + $0xf8] sm:$0xff] }
 0x2bd   :  { %v2913_v44 = vpack.c.bf16 %v1701_v39, %v1699_v37 }
 0x2be   :  { %v1203_v34 = vld [vmem:[#allocation2 + $0x57] sm:$0xff] }
 0x2bf   :  { %2602 = vmatmul.mubr.f32.gmra.mrb[86].mxu1 %v1203_v34  ;;  %2640 = vmatmul.mubr.f32.gmra.mrb[90].mxu0 %v1483_v49  ;;  %v1491_v15 = vld [vmem:[#allocation2 + $0x51] sm:$0xff]  ;;  %v1492_v46 = vld [vmem:[#allocation2 + $0x59] sm:$0xff] }
 0x2c0   :  { %2642 = vmatprep.mubr.msk.f32.mxu0 %vm3086_vm0, %v3517_v27  ;;  %1778 = vmatprep.mubr.f32.mxu1 %v3517_v27  ;;  %v1698_v34 = vld [vmem:[#allocation11 + $0xe0] sm:$0xff]  ;;  %v1700_v49 = vld [vmem:[#allocation11 + $0xf0] sm:$0xff] }
 0x2c3   :  { %2643 = vmatmul.mubr.f32.gmra.mrb[92].mxu0 %v1484_v60  ;;  %v2915_v60 = vpack.c.bf16 %v1700_v49, %v1698_v34 }
 0x2c4   :  { %2645 = vmatprep.mubr.msk.f32.mxu0 %vm3086_vm0, %v3517_v27 }
 0x2c7   :  { %2646 = vmatmul.mubr.f32.gmra.mrb[94].mxu0 %v1485_v6 }
 0x2c8   :  { %2648 = vmatprep.mubr.msk.f32.mxu0 %vm3086_vm0, %v3517_v27 }
 0x2cb   :  { %2649 = vmatmul.mubr.f32.gmra.mrb[96].mxu0 %v1486_v43 }
 0x2cc   :  { %2651 = vmatprep.mubr.msk.f32.mxu0 %vm3086_vm0, %v3517_v27 }
 0x2cf   :  { %2652 = vmatmul.mubr.f32.gmra.mrb[98].mxu0 %v1487_v22 }
 0x2d0   :  { %2654 = vmatprep.mubr.msk.f32.mxu0 %vm3086_vm0, %v3517_v27 }
 0x2d3   :  { %2655 = vmatmul.mubr.f32.gmra.mrb[100].mxu0 %v1488_v28 }
 0x2d4   :  { %2657 = vmatprep.mubr.msk.f32.mxu0 %vm3086_vm0, %v3517_v27 }
 0x2d7   :  { %2658 = vmatmul.mubr.f32.gmra.mrb[102].mxu0 %v1489_v26 }
 0x2d8   :  { %2660 = vmatprep.mubr.msk.f32.mxu0 %vm3086_vm0, %v3517_v27 }
 0x2db   :  { %2661 = vmatmul.mubr.f32.gmra.mrb[104].mxu0 %v1490_v13 }
 0x2dc   :  { %2663 = vmatprep.mubr.msk.f32.mxu0 %vm3086_vm0, %v3517_v27 }
 0x2df   :  { %2664 = vmatmul.mubr.f32.gmra.mrb[106].mxu0 %v1491_v15 }
 0x2e0   :  { %2666 = vmatprep.mubr.msk.f32.mxu0 %vm3086_vm0, %v3517_v27  ;;  %v1681_v27 = vld [vmem:[#allocation11 + $0x58] sm:$0xff] }
 0x2e1   :  { %v2893_v21 = vpack.c.bf16 %v1681_v27, %v1679_v4 }
 0x2e3   :  { %2667 = vmatmul.mubr.f32.gmra.mrb[108].mxu0 %v1492_v46  ;;  %2894 = vmatprep.subr.bf16.mxu1 %v2893_v21 }
 0x2e4   :  { %2896 = vmatpush1.bf16.msra.mxu1 %v2895_v58 }
 0x2e5   :  { %2898 = vmatprep.subr.bf16.mxu1 %v2897_v53 }
 0x2e8   :  { %2900 = vmatpush1.bf16.msra.mxu1 %v2899_v41 }
 0x2e9   :  { %2902 = vmatprep.subr.bf16.mxu1 %v2901_v3 }
 0x2ec   :  { %2904 = vmatpush1.bf16.msra.mxu1 %v2903_v16 }
 0x2ed   :  { %2906 = vmatprep.subr.bf16.mxu1 %v2905_v61 }
 0x2f0   :  { %2908 = vmatpush1.bf16.msra.mxu1 %v2907_v19 }
 0x2f1   :  { %2910 = vmatprep.subr.bf16.mxu1 %v2909_v1 }
 0x2f4   :  { %2912 = vmatpush1.bf16.msra.mxu1 %v2911_v9 }
 0x2f5   :  { %2914 = vmatprep.subr.bf16.mxu1 %v2913_v44 }
 0x2f8   :  { %2916 = vmatpush1.bf16.msra.mxu1 %v2915_v60 }
 0x362   :  { %v1314_v6 = vpop.f32.mrb[66].mxu0 }
 0x363   :  { %v2508_v43 = vpop.f32.mrb[67].mxu0 }
 0x366   :  { %v1319_v22 = vpop.f32.mrb[68].mxu0 }
 0x367   :  { %v2511_v28 = vpop.f32.mrb[69].mxu0 }
 0x36a   :  { %v1431_v26 = vpop.f32.mrb[66].mxu1  ;;  %v1324_v13 = vpop.f32.mrb[70].mxu0 }
 0x36b   :  { %v1432_v15 = vadd.f32 %v1431_v26, %v1314_v6  ;;  %v2573_v46 = vpop.f32.mrb[67].mxu1  ;;  %v2514_v55 = vpop.f32.mrb[71].mxu0 }
 0x36e   :  { %v1436_v32 = vpop.f32.mrb[68].mxu1  ;;  %v1328_v11 = vpop.f32.mrb[72].mxu0 }
 0x36f   :  { %v1437_v24 = vadd.f32 %v1436_v32, %v1319_v22  ;;  %v2576_v25 = vpop.f32.mrb[69].mxu1  ;;  %v2517_v30 = vpop.f32.mrb[73].mxu0  ;;  %v1840_v22 = vld [vmem:[%s3801_s6] ss:$0 sm:$0xff] }
 0x372   :  { %v1441_v35 = vpop.f32.mrb[70].mxu1  ;;  %v1333_v42 = vpop.f32.mrb[74].mxu0 }
 0x373   :  { %v2579_v59 = vpop.f32.mrb[71].mxu1  ;;  %v2520_v38 = vpop.f32.mrb[75].mxu0 }
 0x376   :  { %v1445_v36 = vpop.f32.mrb[72].mxu1  ;;  %v1338_v48 = vpop.f32.mrb[76].mxu0 }
 0x377   :  { %v1446_v4 = vadd.f32 %v1445_v36, %v1328_v11  ;;  %v2582_v27 = vpop.f32.mrb[73].mxu1  ;;  %v2523_v21 = vpop.f32.mrb[77].mxu0 }
 0x37a   :  { %v1450_v7 = vpop.f32.mrb[74].mxu1  ;;  %v1342_v50 = vpop.f32.mrb[78].mxu0 }
 0x37b   :  { %v1451_v58 = vadd.f32 %v1450_v7, %v1333_v42  ;;  %v2585_v62 = vpop.f32.mrb[75].mxu1  ;;  %v2526_v5 = vpop.f32.mrb[79].mxu0 }
 0x37e   :  { %v1455_v53 = vpop.f32.mrb[76].mxu1  ;;  %v1347_v52 = vpop.f32.mrb[80].mxu0 }
 0x37f   :  { %v2588_v56 = vpop.f32.mrb[77].mxu1  ;;  %v2529_v41 = vpop.f32.mrb[81].mxu0  ;;  %v2934_v53 = vld [vmem:[#allocation2] sm:$0xff] }
 0x382   :  { %v1459_v57 = vpop.f32.mrb[78].mxu1  ;;  %v1352_v33 = vpop.f32.mrb[82].mxu0 }
 0x383   :  { %v1460_v3 = vadd.f32 %v1459_v57, %v1342_v50  ;;  %v2591_v12 = vpop.f32.mrb[79].mxu1  ;;  %v2532_v10 = vpop.f32.mrb[83].mxu0 }
 0x386   :  { %v1464_v16 = vpop.f32.mrb[80].mxu1  ;;  %v1356_v51 = vpop.f32.mrb[84].mxu0 }
 0x387   :  { %v1465_v2 = vadd.f32 %v1464_v16, %v1347_v52  ;;  %v2594_v61 = vpop.f32.mrb[81].mxu1  ;;  %v2535_v54 = vpop.f32.mrb[85].mxu0 }
 0x38a   :  { %v1469_v0 = vpop.f32.mrb[82].mxu1  ;;  %v1361_v19 = vpop.f32.mrb[86].mxu0 }
 0x38b   :  { %v2597_v18 = vpop.f32.mrb[83].mxu1  ;;  %v2538_v45 = vpop.f32.mrb[87].mxu0 }
 0x38e   :  { %v1473_v1 = vpop.f32.mrb[84].mxu1  ;;  %v1576_v8 = vpop.f32.mrb[88].mxu0 }
 0x38f   :  { %v1474_v20 = vadd.f32 %v1473_v1, %v1356_v51  ;;  %v2600_v9 = vpop.f32.mrb[85].mxu1  ;;  %v1627_v37 = vadd.f32 %v1576_v8, %v1432_v15  ;;  %v2638_v39 = vpop.f32.mrb[89].mxu0 }
 0x391   :  { %v1642_v13 = vadd.f32 %v1840_v22, %v1627_v37 }
 0x392   :  { %v1478_v44 = vpop.f32.mrb[86].mxu1  ;;  %v1581_v34 = vpop.f32.mrb[90].mxu0 }
 0x393   :  { %v1479_v49 = vadd.f32 %v1478_v44, %v1361_v19  ;;  %v2603_v60 = vpop.f32.mrb[87].mxu1  ;;  %v1628_v6 = vadd.f32 %v1581_v34, %v1437_v24  ;;  %v2641_v43 = vpop.f32.mrb[91].mxu0  ;;  %v1650_v11 = vmax.f32 %v1642_v13, 0.0  ;;  %v1704_v44 = vlaneseq }
 0x395   :  { %v1643_v25 = vadd.f32 %v1840_v22, %v1628_v6  ;;  %v1658_v24 = vadd.f32 %v1650_v11, %v3623_v47  ;;  %v1705_v34 = vshrl.u32 %v1704_v44, 7 }
 0x396   :  { %v1586_v28 = vpop.f32.mrb[92].mxu0 }
 0x397   :  { %v2644_v26 = vpop.f32.mrb[93].mxu0  ;;  %v1651_v38 = vmax.f32 %v1643_v25, 0.0  ;;  %v1710_v60 = vsub.s32 1, %v1705_v34 }
 0x39a   :  { %v1590_v46 = vpop.f32.mrb[94].mxu0 }
 0x39b   :  { %v1629_v55 = vadd.f32 %v1590_v46, %v1446_v4  ;;  %v2647_v32 = vpop.f32.mrb[95].mxu0  ;;  %v1659_v4 = vadd.f32 %v1651_v38, %v3630_v17 }
 0x39d   :  { %v1644_v15 = vadd.f32 %v1840_v22, %v1629_v55 }
 0x39e   :  { %v1595_v30 = vpop.f32.mrb[96].mxu0 }
 0x39f   :  { %v1652_v35 = vmax.f32 %v1644_v15, 0.0  ;;  %v1630_v42 = vadd.f32 %v1595_v30, %v1451_v58  ;;  %v2650_v59 = vpop.f32.mrb[97].mxu0 }
 0x3a1   :  { %v1660_v36 = vadd.f32 %v1652_v35, %v3649_v14  ;;  %v1645_v48 = vadd.f32 %v1840_v22, %v1630_v42 }
 0x3a2   :  { %v1600_v27 = vpop.f32.mrb[98].mxu0 }
 0x3a3   :  { %v1666_v21 = vadd.f32 %v1660_v36, %v1658_v24  ;;  %v1653_v7 = vmax.f32 %v1645_v48, 0.0  ;;  %v2653_v50 = vpop.f32.mrb[99].mxu0 }
 0x3a5   :  { %v1661_v62 = vadd.f32 %v1653_v7, %v3662_v40  ;;  %1779 = vmatmul.mubr.f32.vlgmr.msra.gmra.mrb[88].mxu1 %v1666_v21 }
 0x3a6   :  { %v1604_v5 = vpop.f32.mrb[100].mxu0  ;;  %1784 = vmatprep.mubr.f32.mxu1 %v2934_v53 }
 0x3a7   :  { %v1631_v58 = vadd.f32 %v1604_v5, %v1460_v3  ;;  %v2656_v52 = vpop.f32.mrb[101].mxu0  ;;  %v1667_v56 = vadd.f32 %v1661_v62, %v1659_v4 }
 0x3a9   :  { %1785 = vmatmul.mubr.f32.gmra.mrb[90].mxu1 %v1667_v56  ;;  %v1646_v12 = vadd.f32 %v1840_v22, %v1631_v58 }
 0x3aa   :  { %v1609_v47 = vpop.f32.mrb[102].mxu0  ;;  %1790 = vmatprep.mubr.f32.mxu1 %v2934_v53 }
 0x3ab   :  { %v1632_v14 = vadd.f32 %v1609_v47, %v1465_v2  ;;  %v2659_v41 = vpop.f32.mrb[103].mxu0  ;;  %v1654_v51 = vmax.f32 %v1646_v12, 0.0 }
 0x3ad   :  { %v1647_v40 = vadd.f32 %v1840_v22, %v1632_v14  ;;  %v1662_v18 = vadd.f32 %v1654_v51, %v3685_v29  ;;  %v1702_v29 = vld [vmem:[%s3803_s8] sm:$0x3]  ;;  %s3088_s8 = smov [#allocation12]  }
 0x3ae   :  { %v1614_v57 = vpop.f32.mrb[104].mxu0  ;;  %v1711_v6 = vrot.slane %v1702_v29, %v1710_v60  ;;  %s1824_s17 = sshll.u32 %s3088_s8, 4  ;;  %s1825_s17 = int_to_ptr.vmem [resolvable:$true] %s1824_s17 }
 0x3af   :  { %v2662_v33 = vpop.f32.mrb[105].mxu0  ;;  %v1655_v45 = vmax.f32 %v1647_v40, 0.0  ;;  %s3045_s18 = scalar_lea.vmem %s1825_s17, 1024  ;;  %p3050_p13 = scmp.lt.s32.totalorder %s1825_s17, %s1825_s17 }
 0x3b0   :  { %p3046_p12 = scmp.ne.s32.totalorder %s1825_s17, %s3045_s18  ;;  %p3051_p0 = scmp.lt.s32.totalorder %s3045_s18, %s3045_s18 }
 0x3b1   :  { %v1663_v37 = vadd.f32 %v1655_v45, %v3698_v63 }
 0x3b2   :  { %v1618_v10 = vpop.f32.mrb[106].mxu0  ;;  %p3052_p1 = por %p3051_p0, %p3050_p13 }
 0x3b3   :  { %v1633_v16 = vadd.f32 %v1618_v10, %v1474_v20  ;;  %v2665_v17 = vpop.f32.mrb[107].mxu0 }
 0x3b4   :  { %p3053_p2 = pnand %p3052_p1, %p3046_p12 }
 0x3b5   :  { %v1648_v61 = vadd.f32 %v1840_v22, %v1633_v16 }
 0x3b6   :  { %v1623_v54 = vpop.f32.mrb[108].mxu0 }
 0x3b7   :  { %v1656_v0 = vmax.f32 %v1648_v61, 0.0  ;;  %v1634_v19 = vadd.f32 %v1623_v54, %v1479_v49  ;;  %v2668_v3 = vpop.f32.mrb[109].mxu0  ;;  %v1706_v49 = vsub.s32 0, %v1705_v34 }
 0x3b9   :  { %v1664_v1 = vadd.f32 %v1656_v0, %v3720_v23  ;;  %v1649_v2 = vadd.f32 %v1840_v22, %v1634_v19  ;;  %v1707_v23 = vrot.slane %v1702_v29, %v1706_v49 }
 0x3bb   :  { %v1657_v8 = vmax.f32 %v1649_v2, 0.0  ;;  %v1668_v9 = vadd.f32 %v1664_v1, %v1662_v18 }
 0x3bd   :  { %v1665_v20 = vadd.f32 %v1657_v8, %v3731_v31  ;;  %1791 = vmatmul.mubr.f32.gmra.mrb[92].mxu1 %v1668_v9 }
 0x3be   :  { %1796 = vmatprep.mubr.f32.mxu1 %v2934_v53 }
 0x3bf   :  { %v1669_v39 = vadd.f32 %v1665_v20, %v1663_v37 }
 0x3c1   :  { %1797 = vmatmul.mubr.f32.gmra.mrb[94].mxu1 %v1669_v39 }
 0x478   :  { %v1780_v43 = vpop.f32.mrb[88].mxu1 }
 0x479   :  { %v1781_v22 = vadd.f32 %v1780_v43, %v1707_v23  ;;  %v1782_v28 = vpop.f32.mrb[89].mxu1 }
 0x47a   :  { %v1783_v63 = vadd.f32 %v1782_v28, %v1711_v6 }
 0x47b   :  { %v1803_v26 = vmax.f32 %v1781_v22, 0.0 }
 0x47c   :  { %v1804_v31 = vmax.f32 %v1783_v63, 0.0  ;;  %v1786_v13 = vpop.f32.mrb[90].mxu1 }
 0x47d   :  { %1811 = vst [vmem:[#allocation12] sm:$0xff] %v1803_v26  ;;  %v1787_v46 = vadd.f32 %v1786_v13, %v1707_v23  ;;  %v1788_v55 = vpop.f32.mrb[91].mxu1 }
 0x47e   :  { %1812 = vst [vmem:[#allocation12 + $0x8] sm:$0xff] %v1804_v31  ;;  %v1789_v32 = vadd.f32 %v1788_v55, %v1711_v6 }
 0x47f   :  { %v1805_v11 = vmax.f32 %v1787_v46, 0.0 }
 0x480   :  { %v1806_v25 = vmax.f32 %v1789_v32, 0.0 }
 0x481   :  { %1813 = vst [vmem:[#allocation12 + $0x10] sm:$0xff] %v1805_v11 }
 0x482   :  { %1814 = vst [vmem:[#allocation12 + $0x18] sm:$0xff] %v1806_v25 }
 0x490   :  { %v1792_v15 = vpop.f32.mrb[92].mxu1 }
 0x491   :  { %v1793_v30 = vadd.f32 %v1792_v15, %v1707_v23  ;;  %v1794_v35 = vpop.f32.mrb[93].mxu1 }
 0x492   :  { %v1795_v42 = vadd.f32 %v1794_v35, %v1711_v6 }
 0x493   :  { %v1807_v59 = vmax.f32 %v1793_v30, 0.0 }
 0x494   :  { %v1808_v24 = vmax.f32 %v1795_v42, 0.0  ;;  %v1798_v38 = vpop.f32.mrb[94].mxu1 }
 0x495   :  { %1815 = vst [vmem:[#allocation12 + $0x20] sm:$0xff] %v1807_v59  ;;  %v1799_v36 = vadd.f32 %v1798_v38, %v1707_v23  ;;  %v1800_v48 = vpop.f32.mrb[95].mxu1 }
 0x496   :  { %1816 = vst [vmem:[#allocation12 + $0x28] sm:$0xff] %v1808_v24  ;;  %v1801_v27 = vadd.f32 %v1800_v48, %v1711_v6 }
 0x497   :  { %v1809_v21 = vmax.f32 %v1799_v36, 0.0 }
 0x498   :  { %v1810_v7 = vmax.f32 %v1801_v27, 0.0 }
 0x499   :  { %1817 = vst [vmem:[#allocation12 + $0x30] sm:$0xff] %v1809_v21 }
 0x49a   :  { %1818 = vst [vmem:[#allocation12 + $0x38] sm:$0xff] %v1810_v7 }
 0x49b   :  { %3056 = shalt.err (!%p3053_p2)
}
 0x49c   :  { %s3057_s19 = scalar_lea.hbm %s3805_s10, 1024 }
 0x49d   :  { %p3058_p3 = scmp.ne.s32.totalorder %s3805_s10, %s3057_s19  ;;  %p3061_p4 = scmp.lt.u32.totalorder %s3057_s19, %s3805_s10 }
 0x49f   :  { %p3063_p5 = pnand %p3061_p4, %p3058_p3 }
 0x4a1   :  { %3066 = shalt.err (!%p3063_p5)
}
 0x4a2   :  { %1830 = dma.vmem_to_hbm [thread:$0]  %s1825_s17, 1024, %s3805_s10, [#allocation5], %s3082_s3, %s3082_s3, %s3083_s25  }
 0x4a3   :  { %3073 = dma.done.wait [#allocation5], 1024  }
 0x4a4   :  { %3074 = vsyncadd [#allocation5], 4294966272 }
 0x4a5   :  { %1834 = vsyncpa [#allocation4], 1 }
 0x4a6   :  { %1835 = vsyncpa [#allocation7], 1 }
 0x4a7   :  { %1836 = vsyncpa [#allocation10], 1 }
 0x4a8   :  { %1837 = vsyncpa [#allocation5], 1 }

</bundles_post_ra>
